<compile_context>
chip_gen: v5e
topology: v5e:2x2
jax: 0.10.0
libtpu: 0.0.40
codegen_flags: <defaults>
</compile_context>

<pallas_src>
import functools

import jax
import jax.numpy as jnp
import numpy as np
from jax import lax
from jax.experimental import pallas as pl
from jax.experimental.pallas import tpu as pltpu


# ----------------------------------------------------------------------------
# Position encoding (coords_grid + LinearPositionEmbeddingSine, FlowFormer)
# ----------------------------------------------------------------------------
def linear_pos_embedding_sine(ws: int, dim: int) -> jnp.ndarray:
    """(ws*ws, dim) sinusoidal embedding for a ws x ws window."""
    assert dim % 4 == 0
    ys, xs = jnp.meshgrid(jnp.arange(ws, dtype=jnp.float32),
                          jnp.arange(ws, dtype=jnp.float32), indexing="ij")
    xc = xs.reshape(-1, 1)                       # coords[..., 0] = x (column)
    yc = ys.reshape(-1, 1)                       # coords[..., 1] = y (row)
    freq = jnp.linspace(0.0, dim // 4 - 1, dim // 4).astype(jnp.float32)
    # NOTE: literal 3.14 and NORMALIZE_FACOR=1/200 deliberately match
    # FlowFormer's LinearPositionEmbeddingSine (it does NOT use math.pi).
    f = 3.14 * freq * (1.0 / 200.0)
    return jnp.concatenate(
        [jnp.sin(xc * f), jnp.cos(xc * f), jnp.sin(yc * f), jnp.cos(yc * f)],
        axis=-1)


# ----------------------------------------------------------------------------
# Pallas kernel: R window-rows (= R*_w windows) per grid step
# ----------------------------------------------------------------------------
def _lga_rpe_kernel(x_ref, wqkv_ref, add_ref, wp_ref, bp_ref, o_ref, xw_ref,
                    *, ws, num_heads):
    rows, w_cols, _, C = x_ref.shape            # (R*ws, _w, ws, C) NHWC row slab
    R = rows // ws
    GB, n_pad, _ = xw_ref.shape                 # (R*_w windows, padded tokens, C)
    n = ws * ws
    hd = C // num_heads

    # If n was padded up to the sublane tile, keep the pad rows of the
    # persistent scratch at zero (finite keys/values for the masked positions).
    if n_pad > n:
        @pl.when(pl.program_id(0) == 0)
        def _zero_scratch():
            xw_ref[...] = jnp.zeros(xw_ref.shape, xw_ref.dtype)

    # ---- window partition in VMEM: NHWC row-slab -> (GB, n_pad, C) ----------
    # Slab row (i*ws + a) holds row `a` of all `_w` windows of window-row `i`;
    # one sliced store drops it into the window-major scratch (cast to bf16).
    for i in range(R):
        for a in range(ws):
            xw_ref[pl.ds(i * w_cols, w_cols), pl.ds(a * ws, ws), :] = (
                x_ref[i * ws + a].astype(xw_ref.dtype))

    # ---- fused q/k/v projection over all GB*n_pad tokens (one big matmul) ---
    xw = xw_ref[...].reshape(GB * n_pad, C)
    qkv = jnp.dot(xw, wqkv_ref[...], preferred_element_type=jnp.float32)
    # additive term = (pe@wq+bq)*scale | pe@wk+bk | bv, broadcast over windows;
    # single bulk cast to bf16 (no per-head casts).
    qkv = (qkv.reshape(GB, n_pad, 3 * C) + add_ref[...]).astype(jnp.bfloat16)

    # ---- windowed multi-head attention ---------------------------------------
    if n_pad > n:
        key_idx = lax.broadcasted_iota(jnp.int32, (1, n_pad), 1)
        kmask = jnp.where(key_idx < n, 0.0, -1e30).astype(jnp.float32)
    # TODO(synk): fold the per-head loop into one 'gqhd,gkhd->ghqk' einsum once
    # multi-batch-dim dot_general lowering is confirmed on this Mosaic version.
    head_outs = []
    for h in range(num_heads):
        qh = qkv[:, :, h * hd:(h + 1) * hd]
        kh = qkv[:, :, C + h * hd:C + (h + 1) * hd]
        vh = qkv[:, :, 2 * C + h * hd:2 * C + (h + 1) * hd]
        s = jnp.einsum("gqd,gkd->gqk", qh, kh,
                       preferred_element_type=jnp.float32)   # scale pre-folded
        if n_pad > n:
            s = s + kmask
        s = s - jnp.max(s, axis=-1, keepdims=True)
        p = jnp.exp(s)
        p = p * pl.reciprocal(jnp.sum(p, axis=-1, keepdims=True), approx=True)
        head_outs.append(
            jnp.einsum("gqk,gkd->gqd", p.astype(jnp.bfloat16), vh,
                       preferred_element_type=jnp.float32))
    attn = jnp.concatenate(head_outs, axis=-1)                # (GB, n_pad, C)

    # ---- output projection (again a single large-M matmul) -------------------
    out = jnp.dot(attn.reshape(GB * n_pad, C).astype(jnp.bfloat16), wp_ref[...],
                  preferred_element_type=jnp.float32) + bp_ref[...]
    out = out.reshape(GB, n_pad, C).astype(o_ref.dtype)

    # ---- reverse window partition: write back directly in NHWC row-slab layout
    for i in range(R):
        for a in range(ws):
            o_ref[i * ws + a] = out[i * w_cols:(i + 1) * w_cols,
                                    a * ws:(a + 1) * ws, :]


def _pick_window_rows(B, _h, _w, n_pad, C, target_rows=2048,
                      vmem_budget=24 * 1024 * 1024):
    """Window-rows per grid step (must divide _h), sized to a VMEM budget."""
    per_row = C * 72 + 8 * n_pad                 # rough live-VMEM bytes / token
    max_rows = min(target_rows, max(_w * n_pad, vmem_budget // per_row))
    divisors = [r for r in range(1, _h + 1) if _h % r == 0]
    ok = [r for r in divisors if r * _w * n_pad <= max_rows] or [1]
    # keep >= 2 grid steps so the "parallel" axis can split across v7x's 2 TCs
    ok2 = [r for r in ok if (B * _h) // r >= 2]
    return max(ok2) if ok2 else max(ok)


# ----------------------------------------------------------------------------
# Wrapper: padding, free reshapes, weight fusion, pallas_call
# ----------------------------------------------------------------------------
def locally_grouped_attn_rpe(x, size, params, *, num_heads, ws, context=None):
    del context  # accepted for API parity with the PyTorch module, unused.
    B, N, C = x.shape
    H, W = size
    assert N == H * W
    assert C % num_heads == 0 and C % 4 == 0
    hd = C // num_heads
    scale = hd ** (-0.5)
    out_dtype = x.dtype

    pad_r = (ws - W % ws) % ws
    pad_b = (ws - H % ws) % ws
    xh = x.reshape(B, H, W, C)
    if pad_r or pad_b:
        xh = jnp.pad(xh, ((0, 0), (0, pad_b), (0, pad_r), (0, 0)))
    Hp, Wp = H + pad_b, W + pad_r
    _h, _w = Hp // ws, Wp // ws
    n = ws * ws
    n_pad = ((n + 15) // 16) * 16               # sublane/bf16-tile aligned tokens

    # (B, Hp, Wp, C) -> (B*Hp, _w, ws, C): pure metadata reshape, no HBM shuffle.
    x4 = xh.reshape(B * Hp, _w, ws, C)

    # Fold RPE, biases and the attention scale into one fused projection:
    #   qkv = x @ [wq*scale | wk | wv] + [ (pe@wq+bq)*scale | pe@wk+bk | bv ]
    wq, bq = params["wq"], params["bq"]
    wk, bk = params["wk"], params["bk"]
    wv, bv = params["wv"], params["bv"]
    wp, bp = params["wp"], params["bp"]

    pe = linear_pos_embedding_sine(ws, C)                      # (n, C) f32
    add_q = (pe @ wq + bq.reshape(1, C)) * scale
    add_k = pe @ wk + bk.reshape(1, C)
    add_v = jnp.broadcast_to(bv.reshape(1, C), (n, C))
    add_qkv = jnp.concatenate([add_q, add_k, add_v], axis=-1).astype(jnp.float32)
    if n_pad != n:
        add_qkv = jnp.pad(add_qkv, ((0, n_pad - n), (0, 0)))

    wqkv = jnp.concatenate([wq * scale, wk, wv], axis=-1).astype(jnp.bfloat16)
    wp_b = wp.astype(jnp.bfloat16)
    bp_f = bp.reshape(1, C).astype(jnp.float32)

    R = _pick_window_rows(B, _h, _w, n_pad, C)
    GB = R * _w
    steps = (B * _h) // R

    # Advisory cost estimate for XLA's scheduler.
    G = B * _h * _w
    rows_total = G * n_pad
    flops = (2 * rows_total * C * 3 * C + 2 * rows_total * C * C
             + 4 * G * num_heads * n_pad * n_pad * hd)
    transcendentals = G * num_heads * n_pad * n_pad
    bytes_accessed = (B * Hp * Wp * C * (x.dtype.itemsize
                                         + jnp.dtype(out_dtype).itemsize)
                      + wqkv.size * 2 + add_qkv.size * 4 + wp_b.size * 2
                      + bp_f.size * 4)

    kernel = functools.partial(_lga_rpe_kernel, ws=ws, num_heads=num_heads)

    # TODO(synk): mark the constant-index weight specs with
    # pipeline_mode=pl.Buffered(1) to reclaim their double-buffer VMEM.
    out4 = pl.pallas_call(
        kernel,
        out_shape=jax.ShapeDtypeStruct((B * Hp, _w, ws, C), out_dtype),
        grid=(steps,),
        in_specs=[
            pl.BlockSpec((R * ws, _w, ws, C), lambda g: (g, 0, 0, 0)),
            pl.BlockSpec((C, 3 * C), lambda g: (0, 0)),
            pl.BlockSpec((n_pad, 3 * C), lambda g: (0, 0)),
            pl.BlockSpec((C, C), lambda g: (0, 0)),
            pl.BlockSpec((1, C), lambda g: (0, 0)),
        ],
        out_specs=pl.BlockSpec((R * ws, _w, ws, C), lambda g: (g, 0, 0, 0)),
        scratch_shapes=[pltpu.VMEM((GB, n_pad, C), jnp.bfloat16)],
        compiler_params=pltpu.CompilerParams(
            dimension_semantics=("parallel",),        # windows are independent
            vmem_limit_bytes=48 * 1024 * 1024),       # <= 64 MiB physical on v7x
        cost_estimate=pl.CostEstimate(flops=int(flops),
                                      transcendentals=int(transcendentals),
                                      bytes_accessed=int(bytes_accessed)),
    )(x4, wqkv, add_qkv, wp_b, bp_f)

    out = out4.reshape(B, Hp, Wp, C)
    if pad_r or pad_b:
        out = out[:, :H, :W, :]
    return out.reshape(B, N, C)


# ----------------------------------------------------------------------------
# Pure-JAX f32 reference (mirrors the PyTorch module) for a correctness check
# ----------------------------------------------------------------------------
def reference(x, size, params, *, num_heads, ws):
    B, N, C = x.shape
    H, W = size
    hd = C // num_heads
    scale = hd ** (-0.5)

    pad_r = (ws - W % ws) % ws
    pad_b = (ws - H % ws) % ws
    xh = jnp.pad(x.reshape(B, H, W, C), ((0, 0), (0, pad_b), (0, pad_r), (0, 0)))
    Hp, Wp = H + pad_b, W + pad_r
    _h, _w = Hp // ws, Wp // ws
    n = ws * ws

    xw = (xh.reshape(B, _h, ws, _w, ws, C)
            .transpose(0, 1, 3, 2, 4, 5).reshape(-1, n, C))
    v = xw @ params["wv"] + params["bv"].reshape(1, C)          # v: no PE
    pe = linear_pos_embedding_sine(ws, C)
    x_pe = xw + pe[None]                                        # q/k: with PE
    q = x_pe @ params["wq"] + params["bq"].reshape(1, C)
    k = x_pe @ params["wk"] + params["bk"].reshape(1, C)

    def heads(t):
        return t.reshape(-1, n, num_heads, hd).transpose(0, 2, 1, 3)

    qh, kh, vh = heads(q), heads(k), heads(v)
    attn = jnp.einsum("ghqd,ghkd->ghqk", qh, kh) * scale
    attn = jax.nn.softmax(attn, axis=-1)
    o = jnp.einsum("ghqk,ghkd->ghqd", attn, vh).transpose(0, 2, 1, 3)
    o = o.reshape(B, _h, _w, ws, ws, C).transpose(0, 1, 3, 2, 4, 5)
    o = o.reshape(B, Hp, Wp, C)[:, :H, :W, :].reshape(B, N, C)
    return o @ params["wp"] + params["bp"].reshape(1, C)


# ----------------------------------------------------------------------------
if __name__ == "__main__":
    key = jax.random.PRNGKey(0)
    B, H, W = 2, 8, 8
    dim, num_heads, ws = 32, 2, 4
    N = H * W

    keys = jax.random.split(key, 9)
    x = jax.random.normal(keys[0], (B, N, dim), dtype=jnp.float32)

    def init(k, shape, s=0.05):
        return s * jax.random.normal(k, shape, dtype=jnp.float32)

    # nn.Linear weights stored as (in, out) so y = x @ W + b
    params = {
        "wq": init(keys[1], (dim, dim)), "bq": init(keys[2], (1, dim)),
        "wk": init(keys[3], (dim, dim)), "bk": init(keys[4], (1, dim)),
        "wv": init(keys[5], (dim, dim)), "bv": init(keys[6], (1, dim)),
        "wp": init(keys[7], (dim, dim)), "bp": init(keys[8], (1, dim)),
    }

    out = locally_grouped_attn_rpe(x, (H, W), params,
                                   num_heads=num_heads, ws=ws)
    out = jax.block_until_ready(out)

    ref = reference(x, (H, W), params, num_heads=num_heads, ws=ws)
    # bf16 matmul operands with f32 accumulation vs pure-f32 reference.
    np.testing.assert_allclose(np.asarray(out), np.asarray(ref),
                               rtol=2e-2, atol=2e-2)
    print("KERNEL_OK")
</pallas_src>

<mosaic_0001>
module attributes {stable_mosaic.version = 11 : i64} {
  func.func @_lga_rpe_kernel(%arg0: i32, %arg1: memref<8x2x4x32xf32, #tpu.memory_space<vmem>>, %arg2: memref<32x96xbf16, #tpu.memory_space<vmem>>, %arg3: memref<16x96xf32, #tpu.memory_space<vmem>>, %arg4: memref<32x32xbf16, #tpu.memory_space<vmem>>, %arg5: memref<1x32xf32, #tpu.memory_space<vmem>>, %arg6: memref<8x2x4x32xf32, #tpu.memory_space<vmem>>, %arg7: memref<4x16x32xbf16, #tpu.memory_space<vmem>>) attributes {dimension_semantics = [#tpu.dimension_semantics<parallel>], iteration_bounds = array<i64: 2>, scalar_prefetch = 0 : i64, scratch_operands = 1 : i64, tpu.core_type = #tpu.core_type<tc>, window_params = [{transform_indices = @transform_0, window_bounds = array<i64: 8, 2, 4, 32>}, {pipeline_mode = #tpu.pipeline_mode<synchronous>, transform_indices = @transform_1, window_bounds = array<i64: 32, 96>}, {pipeline_mode = #tpu.pipeline_mode<synchronous>, transform_indices = @transform_2, window_bounds = array<i64: 16, 96>}, {pipeline_mode = #tpu.pipeline_mode<synchronous>, transform_indices = @transform_3, window_bounds = array<i64: 32, 32>}, {pipeline_mode = #tpu.pipeline_mode<synchronous>, transform_indices = @transform_4, window_bounds = array<i64: 1, 32>}, {transform_indices = @transform_5, window_bounds = array<i64: 8, 2, 4, 32>}]} {
    %c0 = arith.constant 0 : index
    %c0_0 = arith.constant 0 : index
    %c0_1 = arith.constant 0 : index
    %c0_2 = arith.constant 0 : index
    %0 = vector.load %arg1[%c0, %c0_0, %c0_1, %c0_2] : memref<8x2x4x32xf32, #tpu.memory_space<vmem>>, vector<1x2x4x32xf32>
    %1 = vector.shape_cast %0 : vector<1x2x4x32xf32> to vector<2x4x32xf32>
    %2 = arith.truncf %1 : vector<2x4x32xf32> to vector<2x4x32xbf16>
    %c0_3 = arith.constant 0 : index
    %c0_4 = arith.constant 0 : index
    %c0_5 = arith.constant 0 : index
    %3 = vector.load %arg7[%c0_3, %c0_4, %c0_5] : memref<4x16x32xbf16, #tpu.memory_space<vmem>>, vector<2x4x32xbf16>
    tpu.vector_store %arg7[%c0_3, %c0_4, %c0_5], %2 {strides = array<i32>} : memref<4x16x32xbf16, #tpu.memory_space<vmem>>, vector<2x4x32xbf16>,
    %c1 = arith.constant 1 : index
    %c0_6 = arith.constant 0 : index
    %c0_7 = arith.constant 0 : index
    %c0_8 = arith.constant 0 : index
    %4 = vector.load %arg1[%c1, %c0_6, %c0_7, %c0_8] : memref<8x2x4x32xf32, #tpu.memory_space<vmem>>, vector<1x2x4x32xf32>
    %5 = vector.shape_cast %4 : vector<1x2x4x32xf32> to vector<2x4x32xf32>
    %6 = arith.truncf %5 : vector<2x4x32xf32> to vector<2x4x32xbf16>
    %c0_9 = arith.constant 0 : index
    %c4 = arith.constant 4 : index
    %c0_10 = arith.constant 0 : index
    %7 = vector.load %arg7[%c0_9, %c4, %c0_10] : memref<4x16x32xbf16, #tpu.memory_space<vmem>>, vector<2x4x32xbf16>
    tpu.vector_store %arg7[%c0_9, %c4, %c0_10], %6 {strides = array<i32>} : memref<4x16x32xbf16, #tpu.memory_space<vmem>>, vector<2x4x32xbf16>,
    %c2 = arith.constant 2 : index
    %c0_11 = arith.constant 0 : index
    %c0_12 = arith.constant 0 : index
    %c0_13 = arith.constant 0 : index
    %8 = vector.load %arg1[%c2, %c0_11, %c0_12, %c0_13] : memref<8x2x4x32xf32, #tpu.memory_space<vmem>>, vector<1x2x4x32xf32>
    %9 = vector.shape_cast %8 : vector<1x2x4x32xf32> to vector<2x4x32xf32>
    %10 = arith.truncf %9 : vector<2x4x32xf32> to vector<2x4x32xbf16>
    %c0_14 = arith.constant 0 : index
    %c8 = arith.constant 8 : index
    %c0_15 = arith.constant 0 : index
    %11 = vector.load %arg7[%c0_14, %c8, %c0_15] : memref<4x16x32xbf16, #tpu.memory_space<vmem>>, vector<2x4x32xbf16>
    tpu.vector_store %arg7[%c0_14, %c8, %c0_15], %10 {strides = array<i32>} : memref<4x16x32xbf16, #tpu.memory_space<vmem>>, vector<2x4x32xbf16>,
    %c3 = arith.constant 3 : index
    %c0_16 = arith.constant 0 : index
    %c0_17 = arith.constant 0 : index
    %c0_18 = arith.constant 0 : index
    %12 = vector.load %arg1[%c3, %c0_16, %c0_17, %c0_18] : memref<8x2x4x32xf32, #tpu.memory_space<vmem>>, vector<1x2x4x32xf32>
    %13 = vector.shape_cast %12 : vector<1x2x4x32xf32> to vector<2x4x32xf32>
    %14 = arith.truncf %13 : vector<2x4x32xf32> to vector<2x4x32xbf16>
    %c0_19 = arith.constant 0 : index
    %c12 = arith.constant 12 : index
    %c0_20 = arith.constant 0 : index
    %15 = vector.load %arg7[%c0_19, %c12, %c0_20] : memref<4x16x32xbf16, #tpu.memory_space<vmem>>, vector<2x4x32xbf16>
    tpu.vector_store %arg7[%c0_19, %c12, %c0_20], %14 {strides = array<i32>} : memref<4x16x32xbf16, #tpu.memory_space<vmem>>, vector<2x4x32xbf16>,
    %c4_21 = arith.constant 4 : index
    %c0_22 = arith.constant 0 : index
    %c0_23 = arith.constant 0 : index
    %c0_24 = arith.constant 0 : index
    %16 = vector.load %arg1[%c4_21, %c0_22, %c0_23, %c0_24] : memref<8x2x4x32xf32, #tpu.memory_space<vmem>>, vector<1x2x4x32xf32>
    %17 = vector.shape_cast %16 : vector<1x2x4x32xf32> to vector<2x4x32xf32>
    %18 = arith.truncf %17 : vector<2x4x32xf32> to vector<2x4x32xbf16>
    %c2_25 = arith.constant 2 : index
    %c0_26 = arith.constant 0 : index
    %c0_27 = arith.constant 0 : index
    %19 = vector.load %arg7[%c2_25, %c0_26, %c0_27] : memref<4x16x32xbf16, #tpu.memory_space<vmem>>, vector<2x4x32xbf16>
    tpu.vector_store %arg7[%c2_25, %c0_26, %c0_27], %18 {strides = array<i32>} : memref<4x16x32xbf16, #tpu.memory_space<vmem>>, vector<2x4x32xbf16>,
    %c5 = arith.constant 5 : index
    %c0_28 = arith.constant 0 : index
    %c0_29 = arith.constant 0 : index
    %c0_30 = arith.constant 0 : index
    %20 = vector.load %arg1[%c5, %c0_28, %c0_29, %c0_30] : memref<8x2x4x32xf32, #tpu.memory_space<vmem>>, vector<1x2x4x32xf32>
    %21 = vector.shape_cast %20 : vector<1x2x4x32xf32> to vector<2x4x32xf32>
    %22 = arith.truncf %21 : vector<2x4x32xf32> to vector<2x4x32xbf16>
    %c2_31 = arith.constant 2 : index
    %c4_32 = arith.constant 4 : index
    %c0_33 = arith.constant 0 : index
    %23 = vector.load %arg7[%c2_31, %c4_32, %c0_33] : memref<4x16x32xbf16, #tpu.memory_space<vmem>>, vector<2x4x32xbf16>
    tpu.vector_store %arg7[%c2_31, %c4_32, %c0_33], %22 {strides = array<i32>} : memref<4x16x32xbf16, #tpu.memory_space<vmem>>, vector<2x4x32xbf16>,
    %c6 = arith.constant 6 : index
    %c0_34 = arith.constant 0 : index
    %c0_35 = arith.constant 0 : index
    %c0_36 = arith.constant 0 : index
    %24 = vector.load %arg1[%c6, %c0_34, %c0_35, %c0_36] : memref<8x2x4x32xf32, #tpu.memory_space<vmem>>, vector<1x2x4x32xf32>
    %25 = vector.shape_cast %24 : vector<1x2x4x32xf32> to vector<2x4x32xf32>
    %26 = arith.truncf %25 : vector<2x4x32xf32> to vector<2x4x32xbf16>
    %c2_37 = arith.constant 2 : index
    %c8_38 = arith.constant 8 : index
    %c0_39 = arith.constant 0 : index
    %27 = vector.load %arg7[%c2_37, %c8_38, %c0_39] : memref<4x16x32xbf16, #tpu.memory_space<vmem>>, vector<2x4x32xbf16>
    tpu.vector_store %arg7[%c2_37, %c8_38, %c0_39], %26 {strides = array<i32>} : memref<4x16x32xbf16, #tpu.memory_space<vmem>>, vector<2x4x32xbf16>,
    %c7 = arith.constant 7 : index
    %c0_40 = arith.constant 0 : index
    %c0_41 = arith.constant 0 : index
    %c0_42 = arith.constant 0 : index
    %28 = vector.load %arg1[%c7, %c0_40, %c0_41, %c0_42] : memref<8x2x4x32xf32, #tpu.memory_space<vmem>>, vector<1x2x4x32xf32>
    %29 = vector.shape_cast %28 : vector<1x2x4x32xf32> to vector<2x4x32xf32>
    %30 = arith.truncf %29 : vector<2x4x32xf32> to vector<2x4x32xbf16>
    %c2_43 = arith.constant 2 : index
    %c12_44 = arith.constant 12 : index
    %c0_45 = arith.constant 0 : index
    %31 = vector.load %arg7[%c2_43, %c12_44, %c0_45] : memref<4x16x32xbf16, #tpu.memory_space<vmem>>, vector<2x4x32xbf16>
    tpu.vector_store %arg7[%c2_43, %c12_44, %c0_45], %30 {strides = array<i32>} : memref<4x16x32xbf16, #tpu.memory_space<vmem>>, vector<2x4x32xbf16>,
    %c0_46 = arith.constant 0 : index
    %c0_47 = arith.constant 0 : index
    %c0_48 = arith.constant 0 : index
    %32 = vector.load %arg7[%c0_46, %c0_47, %c0_48] : memref<4x16x32xbf16, #tpu.memory_space<vmem>>, vector<4x16x32xbf16>
    %33 = vector.shape_cast %32 : vector<4x16x32xbf16> to vector<64x32xbf16>
    %c0_49 = arith.constant 0 : index
    %c0_50 = arith.constant 0 : index
    %34 = vector.load %arg2[%c0_49, %c0_50] : memref<32x96xbf16, #tpu.memory_space<vmem>>, vector<32x96xbf16>
    %cst = arith.constant dense<0.000000e+00> : vector<64x96xf32>
    %35 = tpu.matmul %33, %34, %cst {dimension_numbers = #tpu.dot_dimension_numbers<[1], [0], [0], [1], [0, 0, 1, 1], [], []>} : vector<64x32xbf16>, vector<32x96xbf16>, vector<64x96xf32> -> vector<64x96xf32>
    %36 = vector.shape_cast %35 : vector<64x96xf32> to vector<4x16x96xf32>
    %c0_51 = arith.constant 0 : index
    %c0_52 = arith.constant 0 : index
    %37 = vector.load %arg3[%c0_51, %c0_52] : memref<16x96xf32, #tpu.memory_space<vmem>>, vector<16x96xf32>
    %38 = vector.shape_cast %37 : vector<16x96xf32> to vector<1x16x96xf32>
    %39 = vector.broadcast %38 : vector<1x16x96xf32> to vector<4x16x96xf32>
    %40 = arith.addf %36, %39 : vector<4x16x96xf32>
    %41 = arith.truncf %40 : vector<4x16x96xf32> to vector<4x16x96xbf16>
    %42 = vector.extract_strided_slice %41 {offsets = [0, 0, 0], sizes = [4, 16, 16], strides = [1, 1, 1]} : vector<4x16x96xbf16> to vector<4x16x16xbf16>
    %43 = vector.extract_strided_slice %41 {offsets = [0, 0, 32], sizes = [4, 16, 16], strides = [1, 1, 1]} : vector<4x16x96xbf16> to vector<4x16x16xbf16>
    %44 = vector.extract_strided_slice %41 {offsets = [0, 0, 64], sizes = [4, 16, 16], strides = [1, 1, 1]} : vector<4x16x96xbf16> to vector<4x16x16xbf16>
    "tpu.trace_start"() <{level = 10 : i32, message = "gqd,gkd->gqk"}> : () -> ()
    %cst_53 = arith.constant dense<0.000000e+00> : vector<4x16x16xf32>
    %45 = tpu.matmul %42, %43, %cst_53 {dimension_numbers = #tpu.dot_dimension_numbers<[2], [2], [1], [1], [0, 0, 0, 1, 1, 1], [0], [0]>} : vector<4x16x16xbf16>, vector<4x16x16xbf16>, vector<4x16x16xf32> -> vector<4x16x16xf32>
    "tpu.trace_stop"() : () -> ()
    %cst_54 = arith.constant dense<0xFF800000> : vector<4x16xf32>
    %46 = vector.multi_reduction <maximumf>, %45, %cst_54 [2] : vector<4x16x16xf32> to vector<4x16xf32>
    %47 = vector.shape_cast %46 : vector<4x16xf32> to vector<4x16x1xf32>
    %48 = vector.broadcast %47 : vector<4x16x1xf32> to vector<4x16x16xf32>
    %49 = arith.subf %45, %48 : vector<4x16x16xf32>
    %50 = math.exp %49 : vector<4x16x16xf32>
    %cst_55 = arith.constant dense<0.000000e+00> : vector<4x16xf32>
    %51 = vector.multi_reduction <add>, %50, %cst_55 [2] : vector<4x16x16xf32> to vector<4x16xf32>
    %52 = vector.shape_cast %51 : vector<4x16xf32> to vector<4x16x1xf32>
    %53 = tpu.reciprocal %52 {approx = true} : vector<4x16x1xf32> -> vector<4x16x1xf32>
    %54 = vector.broadcast %53 : vector<4x16x1xf32> to vector<4x16x16xf32>
    %55 = arith.mulf %50, %54 : vector<4x16x16xf32>
    %56 = arith.truncf %55 : vector<4x16x16xf32> to vector<4x16x16xbf16>
    "tpu.trace_start"() <{level = 10 : i32, message = "gqk,gkd->gqd"}> : () -> ()
    %cst_56 = arith.constant dense<0.000000e+00> : vector<4x16x16xf32>
    %57 = tpu.matmul %56, %44, %cst_56 {dimension_numbers = #tpu.dot_dimension_numbers<[2], [1], [1], [2], [0, 0, 0, 1, 1, 2], [0], [0]>} : vector<4x16x16xbf16>, vector<4x16x16xbf16>, vector<4x16x16xf32> -> vector<4x16x16xf32>
    "tpu.trace_stop"() : () -> ()
    %58 = vector.extract_strided_slice %41 {offsets = [0, 0, 16], sizes = [4, 16, 16], strides = [1, 1, 1]} : vector<4x16x96xbf16> to vector<4x16x16xbf16>
    %59 = vector.extract_strided_slice %41 {offsets = [0, 0, 48], sizes = [4, 16, 16], strides = [1, 1, 1]} : vector<4x16x96xbf16> to vector<4x16x16xbf16>
    %60 = vector.extract_strided_slice %41 {offsets = [0, 0, 80], sizes = [4, 16, 16], strides = [1, 1, 1]} : vector<4x16x96xbf16> to vector<4x16x16xbf16>
    "tpu.trace_start"() <{level = 10 : i32, message = "gqd,gkd->gqk"}> : () -> ()
    %cst_57 = arith.constant dense<0.000000e+00> : vector<4x16x16xf32>
    %61 = tpu.matmul %58, %59, %cst_57 {dimension_numbers = #tpu.dot_dimension_numbers<[2], [2], [1], [1], [0, 0, 0, 1, 1, 1], [0], [0]>} : vector<4x16x16xbf16>, vector<4x16x16xbf16>, vector<4x16x16xf32> -> vector<4x16x16xf32>
    "tpu.trace_stop"() : () -> ()
    %cst_58 = arith.constant dense<0xFF800000> : vector<4x16xf32>
    %62 = vector.multi_reduction <maximumf>, %61, %cst_58 [2] : vector<4x16x16xf32> to vector<4x16xf32>
    %63 = vector.shape_cast %62 : vector<4x16xf32> to vector<4x16x1xf32>
    %64 = vector.broadcast %63 : vector<4x16x1xf32> to vector<4x16x16xf32>
    %65 = arith.subf %61, %64 : vector<4x16x16xf32>
    %66 = math.exp %65 : vector<4x16x16xf32>
    %cst_59 = arith.constant dense<0.000000e+00> : vector<4x16xf32>
    %67 = vector.multi_reduction <add>, %66, %cst_59 [2] : vector<4x16x16xf32> to vector<4x16xf32>
    %68 = vector.shape_cast %67 : vector<4x16xf32> to vector<4x16x1xf32>
    %69 = tpu.reciprocal %68 {approx = true} : vector<4x16x1xf32> -> vector<4x16x1xf32>
    %70 = vector.broadcast %69 : vector<4x16x1xf32> to vector<4x16x16xf32>
    %71 = arith.mulf %66, %70 : vector<4x16x16xf32>
    %72 = arith.truncf %71 : vector<4x16x16xf32> to vector<4x16x16xbf16>
    "tpu.trace_start"() <{level = 10 : i32, message = "gqk,gkd->gqd"}> : () -> ()
    %cst_60 = arith.constant dense<0.000000e+00> : vector<4x16x16xf32>
    %73 = tpu.matmul %72, %60, %cst_60 {dimension_numbers = #tpu.dot_dimension_numbers<[2], [1], [1], [2], [0, 0, 0, 1, 1, 2], [0], [0]>} : vector<4x16x16xbf16>, vector<4x16x16xbf16>, vector<4x16x16xf32> -> vector<4x16x16xf32>
    "tpu.trace_stop"() : () -> ()
    %74 = tpu.concatenate %57, %73 in 2 : vector<4x16x16xf32>, vector<4x16x16xf32> -> vector<4x16x32xf32>
    %75 = vector.shape_cast %74 : vector<4x16x32xf32> to vector<64x32xf32>
    %76 = arith.truncf %75 : vector<64x32xf32> to vector<64x32xbf16>
    %c0_61 = arith.constant 0 : index
    %c0_62 = arith.constant 0 : index
    %77 = vector.load %arg4[%c0_61, %c0_62] : memref<32x32xbf16, #tpu.memory_space<vmem>>, vector<32x32xbf16>
    %cst_63 = arith.constant dense<0.000000e+00> : vector<64x32xf32>
    %78 = tpu.matmul %76, %77, %cst_63 {dimension_numbers = #tpu.dot_dimension_numbers<[1], [0], [0], [1], [0, 0, 1, 1], [], []>} : vector<64x32xbf16>, vector<32x32xbf16>, vector<64x32xf32> -> vector<64x32xf32>
    %c0_64 = arith.constant 0 : index
    %c0_65 = arith.constant 0 : index
    %79 = vector.load %arg5[%c0_64, %c0_65] : memref<1x32xf32, #tpu.memory_space<vmem>>, vector<1x32xf32>
    %80 = vector.broadcast %79 : vector<1x32xf32> to vector<64x32xf32>
    %81 = arith.addf %78, %80 : vector<64x32xf32>
    %82 = vector.shape_cast %81 : vector<64x32xf32> to vector<4x16x32xf32>
    %83 = vector.extract_strided_slice %82 {offsets = [0, 0, 0], sizes = [2, 4, 32], strides = [1, 1, 1]} : vector<4x16x32xf32> to vector<2x4x32xf32>
    %c0_66 = arith.constant 0 : index
    %c0_67 = arith.constant 0 : index
    %c0_68 = arith.constant 0 : index
    %c0_69 = arith.constant 0 : index
    %84 = vector.load %arg6[%c0_66, %c0_67, %c0_68, %c0_69] : memref<8x2x4x32xf32, #tpu.memory_space<vmem>>, vector<1x2x4x32xf32>
    %85 = vector.shape_cast %84 : vector<1x2x4x32xf32> to vector<2x4x32xf32>
    %86 = vector.shape_cast %83 : vector<2x4x32xf32> to vector<1x2x4x32xf32>
    tpu.vector_store %arg6[%c0_66, %c0_67, %c0_68, %c0_69], %86 {strides = array<i32>} : memref<8x2x4x32xf32, #tpu.memory_space<vmem>>, vector<1x2x4x32xf32>,
    %87 = vector.extract_strided_slice %82 {offsets = [0, 4, 0], sizes = [2, 4, 32], strides = [1, 1, 1]} : vector<4x16x32xf32> to vector<2x4x32xf32>
    %c1_70 = arith.constant 1 : index
    %c0_71 = arith.constant 0 : index
    %c0_72 = arith.constant 0 : index
    %c0_73 = arith.constant 0 : index
    %88 = vector.load %arg6[%c1_70, %c0_71, %c0_72, %c0_73] : memref<8x2x4x32xf32, #tpu.memory_space<vmem>>, vector<1x2x4x32xf32>
    %89 = vector.shape_cast %88 : vector<1x2x4x32xf32> to vector<2x4x32xf32>
    %90 = vector.shape_cast %87 : vector<2x4x32xf32> to vector<1x2x4x32xf32>
    tpu.vector_store %arg6[%c1_70, %c0_71, %c0_72, %c0_73], %90 {strides = array<i32>} : memref<8x2x4x32xf32, #tpu.memory_space<vmem>>, vector<1x2x4x32xf32>,
    %91 = vector.extract_strided_slice %82 {offsets = [0, 8, 0], sizes = [2, 4, 32], strides = [1, 1, 1]} : vector<4x16x32xf32> to vector<2x4x32xf32>
    %c2_74 = arith.constant 2 : index
    %c0_75 = arith.constant 0 : index
    %c0_76 = arith.constant 0 : index
    %c0_77 = arith.constant 0 : index
    %92 = vector.load %arg6[%c2_74, %c0_75, %c0_76, %c0_77] : memref<8x2x4x32xf32, #tpu.memory_space<vmem>>, vector<1x2x4x32xf32>
    %93 = vector.shape_cast %92 : vector<1x2x4x32xf32> to vector<2x4x32xf32>
    %94 = vector.shape_cast %91 : vector<2x4x32xf32> to vector<1x2x4x32xf32>
    tpu.vector_store %arg6[%c2_74, %c0_75, %c0_76, %c0_77], %94 {strides = array<i32>} : memref<8x2x4x32xf32, #tpu.memory_space<vmem>>, vector<1x2x4x32xf32>,
    %95 = vector.extract_strided_slice %82 {offsets = [0, 12, 0], sizes = [2, 4, 32], strides = [1, 1, 1]} : vector<4x16x32xf32> to vector<2x4x32xf32>
    %c3_78 = arith.constant 3 : index
    %c0_79 = arith.constant 0 : index
    %c0_80 = arith.constant 0 : index
    %c0_81 = arith.constant 0 : index
    %96 = vector.load %arg6[%c3_78, %c0_79, %c0_80, %c0_81] : memref<8x2x4x32xf32, #tpu.memory_space<vmem>>, vector<1x2x4x32xf32>
    %97 = vector.shape_cast %96 : vector<1x2x4x32xf32> to vector<2x4x32xf32>
    %98 = vector.shape_cast %95 : vector<2x4x32xf32> to vector<1x2x4x32xf32>
    tpu.vector_store %arg6[%c3_78, %c0_79, %c0_80, %c0_81], %98 {strides = array<i32>} : memref<8x2x4x32xf32, #tpu.memory_space<vmem>>, vector<1x2x4x32xf32>,
    %99 = vector.extract_strided_slice %82 {offsets = [2, 0, 0], sizes = [2, 4, 32], strides = [1, 1, 1]} : vector<4x16x32xf32> to vector<2x4x32xf32>
    %c4_82 = arith.constant 4 : index
    %c0_83 = arith.constant 0 : index
    %c0_84 = arith.constant 0 : index
    %c0_85 = arith.constant 0 : index
    %100 = vector.load %arg6[%c4_82, %c0_83, %c0_84, %c0_85] : memref<8x2x4x32xf32, #tpu.memory_space<vmem>>, vector<1x2x4x32xf32>
    %101 = vector.shape_cast %100 : vector<1x2x4x32xf32> to vector<2x4x32xf32>
    %102 = vector.shape_cast %99 : vector<2x4x32xf32> to vector<1x2x4x32xf32>
    tpu.vector_store %arg6[%c4_82, %c0_83, %c0_84, %c0_85], %102 {strides = array<i32>} : memref<8x2x4x32xf32, #tpu.memory_space<vmem>>, vector<1x2x4x32xf32>,
    %103 = vector.extract_strided_slice %82 {offsets = [2, 4, 0], sizes = [2, 4, 32], strides = [1, 1, 1]} : vector<4x16x32xf32> to vector<2x4x32xf32>
    %c5_86 = arith.constant 5 : index
    %c0_87 = arith.constant 0 : index
    %c0_88 = arith.constant 0 : index
    %c0_89 = arith.constant 0 : index
    %104 = vector.load %arg6[%c5_86, %c0_87, %c0_88, %c0_89] : memref<8x2x4x32xf32, #tpu.memory_space<vmem>>, vector<1x2x4x32xf32>
    %105 = vector.shape_cast %104 : vector<1x2x4x32xf32> to vector<2x4x32xf32>
    %106 = vector.shape_cast %103 : vector<2x4x32xf32> to vector<1x2x4x32xf32>
    tpu.vector_store %arg6[%c5_86, %c0_87, %c0_88, %c0_89], %106 {strides = array<i32>} : memref<8x2x4x32xf32, #tpu.memory_space<vmem>>, vector<1x2x4x32xf32>,
    %107 = vector.extract_strided_slice %82 {offsets = [2, 8, 0], sizes = [2, 4, 32], strides = [1, 1, 1]} : vector<4x16x32xf32> to vector<2x4x32xf32>
    %c6_90 = arith.constant 6 : index
    %c0_91 = arith.constant 0 : index
    %c0_92 = arith.constant 0 : index
    %c0_93 = arith.constant 0 : index
    %108 = vector.load %arg6[%c6_90, %c0_91, %c0_92, %c0_93] : memref<8x2x4x32xf32, #tpu.memory_space<vmem>>, vector<1x2x4x32xf32>
    %109 = vector.shape_cast %108 : vector<1x2x4x32xf32> to vector<2x4x32xf32>
    %110 = vector.shape_cast %107 : vector<2x4x32xf32> to vector<1x2x4x32xf32>
    tpu.vector_store %arg6[%c6_90, %c0_91, %c0_92, %c0_93], %110 {strides = array<i32>} : memref<8x2x4x32xf32, #tpu.memory_space<vmem>>, vector<1x2x4x32xf32>,
    %111 = vector.extract_strided_slice %82 {offsets = [2, 12, 0], sizes = [2, 4, 32], strides = [1, 1, 1]} : vector<4x16x32xf32> to vector<2x4x32xf32>
    %c7_94 = arith.constant 7 : index
    %c0_95 = arith.constant 0 : index
    %c0_96 = arith.constant 0 : index
    %c0_97 = arith.constant 0 : index
    %112 = vector.load %arg6[%c7_94, %c0_95, %c0_96, %c0_97] : memref<8x2x4x32xf32, #tpu.memory_space<vmem>>, vector<1x2x4x32xf32>
    %113 = vector.shape_cast %112 : vector<1x2x4x32xf32> to vector<2x4x32xf32>
    %114 = vector.shape_cast %111 : vector<2x4x32xf32> to vector<1x2x4x32xf32>
    tpu.vector_store %arg6[%c7_94, %c0_95, %c0_96, %c0_97], %114 {strides = array<i32>} : memref<8x2x4x32xf32, #tpu.memory_space<vmem>>, vector<1x2x4x32xf32>,
    return
  }
  func.func @transform_0(%arg0: i32) -> (i32, i32, i32, i32) {
    %c0_i32 = arith.constant 0 : i32
    %c0_i32_0 = arith.constant 0 : i32
    %c0_i32_1 = arith.constant 0 : i32
    %c0_i32_2 = arith.constant 0 : i32
    return %arg0, %c0_i32, %c0_i32_0, %c0_i32_1 : i32, i32, i32, i32
  }
  func.func @transform_1(%arg0: i32) -> (i32, i32) {
    %c0_i32 = arith.constant 0 : i32
    %c0_i32_0 = arith.constant 0 : i32
    %c0_i32_1 = arith.constant 0 : i32
    return %c0_i32, %c0_i32_0 : i32, i32
  }
  func.func @transform_2(%arg0: i32) -> (i32, i32) {
    %c0_i32 = arith.constant 0 : i32
    %c0_i32_0 = arith.constant 0 : i32
    %c0_i32_1 = arith.constant 0 : i32
    return %c0_i32, %c0_i32_0 : i32, i32
  }
  func.func @transform_3(%arg0: i32) -> (i32, i32) {
    %c0_i32 = arith.constant 0 : i32
    %c0_i32_0 = arith.constant 0 : i32
    %c0_i32_1 = arith.constant 0 : i32
    return %c0_i32, %c0_i32_0 : i32, i32
  }
  func.func @transform_4(%arg0: i32) -> (i32, i32) {
    %c0_i32 = arith.constant 0 : i32
    %c0_i32_0 = arith.constant 0 : i32
    %c0_i32_1 = arith.constant 0 : i32
    return %c0_i32, %c0_i32_0 : i32, i32
  }
  func.func @transform_5(%arg0: i32) -> (i32, i32, i32, i32) {
    %c0_i32 = arith.constant 0 : i32
    %c0_i32_0 = arith.constant 0 : i32
    %c0_i32_1 = arith.constant 0 : i32
    %c0_i32_2 = arith.constant 0 : i32
    return %arg0, %c0_i32, %c0_i32_0, %c0_i32_1 : i32, i32, i32, i32
  }
}

</mosaic_0001>

<bundles_post_ra>
// kernel: tpu_custom_call.1
= control target key start
LH: loop header
LB: loop body
LE: loop exit
PB: predicated region body
PF: predicated region fallthrough
CT: control target
= control target key end

     0   :  { %10 = vsyncpa [#allocation4], 0  ;;  %s2305_s0 = inlined_call_operand.hbm [shape: f32[16,2,4,32], index: 0, kind: input, shape index: {}]   ;;  %s2306_s1 = inlined_call_operand.hbm [shape: bf16[32,96], index: 1, kind: input, shape index: {}]   ;;  %s2307_s2 = inlined_call_operand.hbm [shape: f32[16,96], index: 2, kind: input, shape index: {}]   ;;  %s2308_s3 = inlined_call_operand.hbm [shape: bf16[32,32], index: 3, kind: input, shape index: {}]   ;;  %s2309_s4 = inlined_call_operand.vmem [shape: f32[1,32], index: 4, kind: input, shape index: {}]   ;;  %s2310_s5 = inlined_call_operand.hbm [shape: f32[16,2,4,32], index: 5, kind: output, shape index: {}]  }
   0x1   :  { %12 = vsyncpa [#allocation4 + $0x1], 0 }
   0x2   :  { %13 = vsyncpa [#allocation7], 0 }
   0x3   :  { %14 = vsyncpa [#allocation10], 0 }
   0x4   :  { %15 = vsyncpa [#allocation5], 0 }
   0x5   :  { %17 = vsyncpa [#allocation5 + $0x1], 0  ;;  %s1868_s18 = smov 0   ;;  %s1870_s19 = smov 0  }
   0x6   :  { %s1872_s20 = smov 0   ;;  %s1874_s21 = smov 0  }
   0x7 LB: > { %s1889_s22 = sadd.s32 4294967295, %s1822_s21   ;;  %s1331_s23 = sadd.s32 4294967294, %s1822_s21   ;;  %s1822_s21 = sphi %s1874_s21, %s2323_s21   ;;  %s1818_s20 = sphi %s1872_s20, %s2322_s20   ;;  %s1814_s19 = sphi %s1870_s19, %s2321_s19   ;;  %s1810_s18 = sphi %s1868_s18, %s2320_s18  }
   0x8   : > { %p43_p0 = scmp.ne.s32.totalorder %s1814_s19, %s1810_s18  ;;  %p44_p1 = scmp.eq.s32.totalorder %s1889_s22, 0 }
   0x9   : > { %p151_p2 = scmp.eq.s32.totalorder %s1889_s22, 1  ;;  %p157_p3 = scmp.eq.s32.totalorder %s1331_s23, 1 }
   0xa   : > { %p1898_p4 = por %p44_p1, %p43_p0  ;;  %p1332_p5 = scmp.ge.s32.totalorder %s1822_s21, 1 }
   0xb   : > { %p1903_p6 = por %p157_p3, %p43_p0  ;;  %p164_p7 = scmp.lt.s32.totalorder %s1822_s21, 3 }
   0xc   : > { %s175_s28 = sshll.u32 %s2306_s1, 4  ;;  %s1824_s30 = smov [#allocation6]   ;;  %s176_s28 = int_to_ptr.hbm [resolvable:$true] %s175_s28 }
   0xd   : > { %p1911_p8 = pnand %p1332_p5, %p164_p7  ;;  %s177_s6 = sshll.u32 %s1824_s30, 4  ;;  %s178_s6 = int_to_ptr.vmem [resolvable:$true] %s177_s6 }
   0xe   : > { %s189_s10 = sshll.u32 %s2307_s2, 4  ;;  %s2311_s11 = smov 64   ;;  %s190_s10 = int_to_ptr.hbm [resolvable:$true] %s189_s10 }
   0xf   : > { %p1471_p9 = pneg %p1911_p8  ;;  %s1826_s12 = smov 4  }
  0x10   : > { %s1827_s13 = smov [#allocation8]   ;;  %s1828_s15 = smov 128  }
  0x11   : > { %p1919_p10 = pnand %p1471_p9, %p44_p1  ;;  %s191_s14 = sshll.u32 %s1827_s13, 4  ;;  %s192_s14 = int_to_ptr.vmem [resolvable:$true] %s191_s14 }
  0x12   : > { %s1829_s16 = smov 8   ;;  %s203_s26 = sshll.u32 %s2308_s3, 4  ;;  %s204_s26 = int_to_ptr.hbm [resolvable:$true] %s203_s26 }
  0x13   : > { %1474 = dma.hbm_to_vmem [thread:$0]  (!%p1919_p10), %s176_s28, 256, %s178_s6, [#allocation7], %s2311_s11, %s2311_s11, %s1826_s12  }
  0x14   : > { %1477 = dma.hbm_to_vmem [thread:$0]  (!%p1919_p10), %s190_s10, 256, %s192_s14, [#allocation7], %s1828_s15, %s1828_s15, %s1829_s16  }
  0x15   : > { %s1830_s27 = smov [#allocation9]   ;;  %s1943_s30 = sadd.s32 1, %s1822_s21  }
  0x16   : > { %s205_s28 = sshll.u32 %s1830_s27, 4  ;;  %s27_s6 = ssub.s32 %s1822_s21, %s1943_s30  ;;  %s206_s28 = int_to_ptr.vmem [resolvable:$true] %s205_s28 }
  0x17   : > { %1480 = dma.hbm_to_vmem [thread:$0]  (!%p1919_p10), %s204_s26, 256, %s206_s28, [#allocation10], %s2311_s11, %s2311_s11, %s1826_s12  }
  0x18   : > { %s30_s8 = sadd.s32 1, %s1818_s20  ;;  %p28_p12 = scmp.eq.s32.totalorder %s27_s6, 0 }
  0x19   : > { %p37_p13 = scmp.ne.s32.totalorder %s1818_s20, %s1814_s19  ;;  %p38_p0 = scmp.eq.s32.totalorder %s1822_s21, 0 }
  0x1a   : > { %s1952_s9 = scalar_select %p28_p12, %s1818_s20, %s30_s8  }
  0x1b   : > { %p1956_p3 = por %p151_p2, %p37_p13  ;;  %p1492_p5 = scmp.lt.s32.totalorder %s1822_s21, 2 }
  0x1c   : > { %s222_s7 = sand.u32 1, %s1818_s20   ;;  %s1438_s13 = sshll.u32 %s1822_s21, 6 }
  0x1d   : > { %p39_p7 = por %p38_p0, %p37_p13  ;;  %s1337_s14 = sshll.u32 %s222_s7, 6 }
  0x1e   : > { %s232_s17 = scalar_lea.hbm %s2305_s0, %s1438_s13  ;;  %s226_s26 = scalar_lea.vmem [#allocation3], %s1337_s14 }
  0x1f   : > { %s233_s23 = sshll.u32 %s232_s17, 4  ;;  %s235_s27 = sshll.u32 %s226_s26, 4  ;;  %s234_s23 = int_to_ptr.hbm [resolvable:$true] %s233_s23  ;;  %s236_s27 = int_to_ptr.vmem [resolvable:$true] %s235_s27 }
  0x20   : > { %p1966_p9 = pnand %p1492_p5, %p39_p7  ;;  %s223_s6 = scalar_lea.sflag [#allocation4], %s222_s7 }
  0x21   : > { %s1718_s8 = sshra.s32 %s234_s23, 4  ;;  %s1725_s14 = scalar_lea.hbm %s2305_s0, 128  ;;  %s1719_s8 = int_to_ptr.hbm [resolvable:$true] %s1718_s8 }
  0x22   : > { %s1720_s11 = scalar_lea.hbm %s1719_s8, 64  ;;  %p1722_p10 = pneg %p1966_p9 }
  0x23   : > { %p1721_p2 = scmp.ne.s32.totalorder %s1719_s8, %s1720_s11  ;;  %p1726_p0 = scmp.lt.s32.totalorder %s1719_s8, %s2305_s0 }
  0x24   : > { %p1727_p5 = scmp.lt.s32.totalorder %s1725_s14, %s1720_s11 }
  0x25   : > { %p1723_p12 = pnand %p1722_p10, %p1721_p2 }
  0x26   : > { %p1728_p7 = por %p1727_p5, %p1726_p0 }
  0x27   : > { %p1724_p13 = pneg %p1723_p12 }
  0x29   : > { %p1729_p11 = pnand %p1728_p7, %p1724_p13 }
  0x2b   : > { %1732 = shalt.err (!%p1729_p11)
}
  0x2c   : > { %s2318_s7 = smov 64   ;;  %247 = sbr.rel (%p1911_p8) target bundleno = 1734 (0x6c6), region = 40 }
  0x2d   : > { %1484 = dma.hbm_to_vmem [thread:$0]  (!%p1966_p9), %s234_s23, 1024, %s236_s27, %s223_s6, %s2318_s7, %s2318_s7, %s1826_s12  }
  0x2e   : > { %s1986_s26 = sand.u32 (!%p1911_p8), 1, %s1814_s19  }
  0x2f   : > { %s1342_s11 = sshll.u32 (!%p1911_p8), %s1986_s26, 6  ;;  %s250_s8 = scalar_lea.sflag (!%p1911_p8), [#allocation4], %s1986_s26 }
  0x30   : > { %s1992_s13 = scalar_lea.vmem (!%p1911_p8), [#allocation3], %s1342_s11 }
  0x31   : > { %1793 = dma.done.wait (%p1898_p4), %s250_s8, 1024  }
  0x32   : > { %1795 = vsyncadd (%p1898_p4), %s250_s8, 4294966272 }
  0x33   : > { %1797 = dma.done.wait (%p44_p1), [#allocation7], 512  }
  0x34   : > { %1799 = vsyncadd (%p44_p1), [#allocation7], 4294966784 }
  0x35   : > { %1801 = dma.done.wait (%p44_p1), [#allocation10], 256  }
  0x36   : > { %1803 = vsyncadd (%p44_p1), [#allocation10], 4294967040  ;;  %v1444_v0 = vld [vmem:[#allocation6 + $0x8] sm:$0xff]  ;;  %v1443_v1 = vld [vmem:[#allocation6] sm:$0xff]  ;;  %vm303_vm0 = vcmask 254976   ;;  %vm317_vm1 = vcmask 257026  }
  0x37   : > { %v299_v2 = vld [vmem:[%s1992_s13] sm:$0xf]  ;;  %v1347_v4 = vld [vmem:[%s1992_s13 + $0x8] sm:$0xf]  ;;  %v1349_v5 = vld [vmem:[%s1992_s13 + $0x10] sm:$0xf]  ;;  %444 = vmatpush.bf16.msra.mxu0 %v1444_v0  ;;  %1449 = vmatpush.bf16.msra.mxu1 %v1444_v0 }
  0x38   : > { %v301_v3 = vpack.c.bf16 %v299_v2, %v299_v2  ;;  %v1351_v6 = vld [vmem:[%s1992_s13 + $0x18] sm:$0xf]  ;;  %v309_v7 = vpack.c.bf16 %v1347_v4, %v1347_v4  ;;  %v323_v8 = vpack.c.bf16 %v1349_v5, %v1349_v5  ;;  %v300_v10 = vld [vmem:[%s1992_s13 + $0x4] sm:$0xf]  ;;  %v1348_v11 = vld [vmem:[%s1992_s13 + $0xc] sm:$0xf]  ;;  %1450 = vmatpush.bf16.msra.mxu2 %v1444_v0  ;;  %1451 = vmatpush.bf16.msra.mxu3 %v1444_v0 }
  0x39   : > { %v330_v9 = vpack.c.bf16 %v1351_v6, %v1351_v6  ;;  %v1350_v12 = vld [vmem:[%s1992_s13 + $0x14] sm:$0xf]  ;;  %v302_v13 = vpack.c.bf16 %v300_v10, %v300_v10  ;;  %v310_v14 = vpack.c.bf16 %v1348_v11, %v1348_v11  ;;  %v1352_v15 = vld [vmem:[%s1992_s13 + $0x1c] sm:$0xf]  ;;  %v1353_v16 = vld [vmem:[%s1992_s13 + $0x20] sm:$0xf] }
  0x3a   : > { %304 = vst.msk [vmem:[#allocation2] sm:$0x3] %vm303_vm0, %v301_v3  ;;  %v313_v17 = vrot.slane %v309_v7, 6  ;;  %v331_v19 = vpack.c.bf16 %v1352_v15, %v1352_v15  ;;  %v1355_v20 = vld [vmem:[%s1992_s13 + $0x28] sm:$0xf]  ;;  %v324_v22 = vpack.c.bf16 %v1350_v12, %v1350_v12  ;;  %v343_v27 = vpack.c.bf16 %v1353_v16, %v1353_v16  ;;  %v467_v48 = vld [vmem:[#allocation8] sm:$0xff] }
  0x3b   : > { %325 = vst.msk [vmem:[#allocation2 + $0x4] sm:$0x3] %vm303_vm0, %v323_v8  ;;  %v334_v18 = vrot.slane %v330_v9, 6  ;;  %v314_v21 = vrot.slane %v310_v14, 6  ;;  %v351_v23 = vpack.c.bf16 %v1355_v20, %v1355_v20  ;;  %v1357_v24 = vld [vmem:[%s1992_s13 + $0x30] sm:$0xf]  ;;  %445 = vmatpush.bf16.msra.mxu0 %v1443_v1  ;;  %1452 = vmatpush.bf16.msra.mxu1 %v1443_v1 }
  0x3c   : > { %305 = vst.msk [vmem:[#allocation2 + $0x8] sm:$0x3] %vm303_vm0, %v302_v13  ;;  %v335_v25 = vrot.slane %v331_v19, 6  ;;  %v1359_v26 = vld [vmem:[%s1992_s13 + $0x38] sm:$0xf]  ;;  %1453 = vmatpush.bf16.msra.mxu2 %v1443_v1  ;;  %1454 = vmatpush.bf16.msra.mxu3 %v1443_v1  ;;  %v364_v32 = vpack.c.bf16 %v1357_v24, %v1357_v24  ;;  %vm425_vm2 = vcmask 261120  }
  0x3d   : > { %318 = vst.msk [vmem:[#allocation2] sm:$0xc] %vm317_vm1, %v313_v17  ;;  %v355_v28 = vrot.slane %v351_v23, 6  ;;  %v371_v29 = vpack.c.bf16 %v1359_v26, %v1359_v26  ;;  %v1354_v30 = vld [vmem:[%s1992_s13 + $0x24] sm:$0xf]  ;;  %v468_v50 = vld [vmem:[#allocation8 + $0x8] sm:$0xff] }
  0x3e   : > { %338 = vst.msk [vmem:[#allocation2 + $0x4] sm:$0xc] %vm317_vm1, %v334_v18  ;;  %v1356_v31 = vld [vmem:[%s1992_s13 + $0x2c] sm:$0xf]  ;;  %v1358_v34 = vld [vmem:[%s1992_s13 + $0x34] sm:$0xf]  ;;  %v344_v38 = vpack.c.bf16 %v1354_v30, %v1354_v30 }
  0x3f   : > { %319 = vst.msk [vmem:[#allocation2 + $0x8] sm:$0xc] %vm317_vm1, %v314_v21  ;;  %v352_v33 = vpack.c.bf16 %v1356_v31, %v1356_v31  ;;  %v1360_v35 = vld [vmem:[%s1992_s13 + $0x3c] sm:$0xf]  ;;  %v375_v36 = vrot.slane %v371_v29, 6  ;;  %v365_v40 = vpack.c.bf16 %v1358_v34, %v1358_v34  ;;  %s1831_s24 = smov 96  }
  0x40   : > { %326 = vst.msk [vmem:[#allocation2 + $0xc] sm:$0x3] %vm303_vm0, %v324_v22  ;;  %v372_v37 = vpack.c.bf16 %v1360_v35, %v1360_v35  ;;  %vm492_vm3 = vcmask 130048   ;;  %s1832_s29 = smov 64   ;;  %s1833_s12 = smov 80   ;;  %vm1187_vm4 = vcmask 257024  }
  0x41   : > { %339 = vst.msk [vmem:[#allocation2 + $0xc] sm:$0xc] %vm317_vm1, %v335_v25  ;;  %v356_v39 = vrot.slane %v352_v33, 6  ;;  %s1834_s23 = smov 112   ;;  %s1835_s27 = smov 48   ;;  %vm1191_vm5 = vcmask 261124  }
  0x42   : > { %346 = vst.msk [vmem:[#allocation2 + $0x10] sm:$0x3] %vm303_vm0, %v343_v27  ;;  %v376_v42 = vrot.slane %v372_v37, 6  ;;  %s1836_s28 = smov 16   ;;  %s2225_s14 = scalar_lea.vmem [#allocation11], %s1342_s11 }
  0x43   : > { %359 = vst.msk [vmem:[#allocation2 + $0x10] sm:$0xc] %vm317_vm1, %v355_v28  ;;  %s1448_s16 = sshll.u32 %s1889_s22, 6  ;;  %s1226_s8 = sshll.u32 %s2225_s14, 4  ;;  %s1227_s8 = int_to_ptr.vmem [resolvable:$true] %s1226_s8 }
  0x44   : > { %366 = vst.msk [vmem:[#allocation2 + $0x14] sm:$0x3] %vm303_vm0, %v364_v32  ;;  %s1225_s11 = scalar_lea.hbm %s2310_s5, %s1448_s16  ;;  %s1213_s22 = scalar_lea.sflag [#allocation5], %s1986_s26 }
  0x45   : > { %v1439_v41 = vld [vmem:[#allocation2] sm:$0xff]  ;;  %379 = vst.msk [vmem:[#allocation2 + $0x14] sm:$0xc] %vm317_vm1, %v375_v36  ;;  %s1228_s13 = sshll.u32 %s1225_s11, 4  ;;  %s1229_s13 = int_to_ptr.hbm [resolvable:$true] %s1228_s13 }
  0x46   : > { %347 = vst.msk [vmem:[#allocation2 + $0x18] sm:$0x3] %vm303_vm0, %v344_v38  ;;  %1385 = vmatmul.msk.bf16.vlgmr.msra.gmra.mxu0 %vm425_vm2, %v1439_v41 }
  0x47   : > { %360 = vst.msk [vmem:[#allocation2 + $0x18] sm:$0xc] %vm317_vm1, %v356_v39 }
  0x48   : > { %v1440_v43 = vld [vmem:[#allocation2 + $0x8] sm:$0xff]  ;;  %367 = vst.msk [vmem:[#allocation2 + $0x1c] sm:$0x3] %vm303_vm0, %v365_v40 }
  0x49   : > { %380 = vst.msk [vmem:[#allocation2 + $0x1c] sm:$0xc] %vm317_vm1, %v376_v42  ;;  %1386 = vmatmul.msk.bf16.vlgmr.msra.gmra.mxu1 %vm425_vm2, %v1440_v43 }
  0x4c   : > { %v1441_v44 = vld [vmem:[#allocation2 + $0x10] sm:$0xff] }
  0x4d   : > { %1387 = vmatmul.msk.bf16.vlgmr.msra.gmra.mxu2 %vm425_vm2, %v1441_v44 }
  0x50   : > { %v1442_v45 = vld [vmem:[#allocation2 + $0x18] sm:$0xff] }
  0x51   : > { %1388 = vmatmul.msk.bf16.vlgmr.msra.gmra.mxu3 %vm425_vm2, %v1442_v45 }
  0xc3   : > { %v447_v46 = vpop.f32.mrf.mxu0 }
  0xc4   : > { %v469_v56 = vadd.f32 %v467_v48, %v447_v46 }
  0xc6   : > { %v452_v47 = vpop.f32.mrf.mxu1  ;;  %v477_v63 = vpack.c.bf16 %v469_v56, %v469_v56 }
  0xc7   : > { %v471_v49 = vadd.f32 %v467_v48, %v452_v47 }
  0xc8   : > { %v487_v4 = vunpack.c.l.b16 %v477_v63 }
  0xc9   : > { %v479_v53 = vpack.c.bf16 %v471_v49, %v471_v49 }
  0xcb   : > { %v449_v51 = vpop.f32.mrf.mxu0  ;;  %v515_v59 = vunpack.c.l.b16 %v479_v53 }
  0xcc   : > { %v470_v57 = vadd.f32 %v468_v50, %v449_v51 }
  0xce   : > { %v454_v52 = vpop.f32.mrf.mxu1  ;;  %v478_v0 = vpack.c.bf16 %v470_v57, %v470_v57 }
  0xcf   : > { %v472_v54 = vadd.f32 %v468_v50, %v454_v52 }
  0xd0   : > { %v457_v55 = vpop.f32.mrf.mxu2  ;;  %v488_v5 = vunpack.c.l.b16 %v478_v0 }
  0xd1   : > { %v480_v58 = vpack.c.bf16 %v472_v54, %v472_v54  ;;  %v473_v60 = vadd.f32 %v467_v48, %v457_v55 }
  0xd2   : > { %v2045_v11 = vpack.c.b16 %v488_v5, %v487_v4 }
  0xd3   : > { %v516_v61 = vunpack.c.l.b16 %v480_v58  ;;  %v481_v2 = vpack.c.bf16 %v473_v60, %v473_v60 }
  0xd4   : > { %v462_v62 = vpop.f32.mrf.mxu3 }
  0xd5   : > { %v2042_v1 = vpack.c.b16 %v516_v61, %v515_v59  ;;  %v475_v7 = vadd.f32 %v467_v48, %v462_v62  ;;  %v542_v8 = vunpack.c.l.b16 %v481_v2 }
  0xd7   : > { %518 = vrot.lane.b32.xlu0 %v2042_v1, %s1831_s24  ;;  %v483_v13 = vpack.c.bf16 %v475_v7, %v475_v7 }
  0xd8   : > { %v459_v3 = vpop.f32.mrf.mxu2 }
  0xd9   : > { %v474_v6 = vadd.f32 %v468_v50, %v459_v3  ;;  %v569_v17 = vunpack.c.l.b16 %v483_v13 }
  0xdb   : > { %v482_v9 = vpack.c.bf16 %v474_v6, %v474_v6 }
  0xdc   : > { %v464_v10 = vpop.f32.mrf.mxu3 }
  0xdd   : > { %v543_v12 = vunpack.c.l.b16 %v482_v9  ;;  %v476_v14 = vadd.f32 %v468_v50, %v464_v10 }
  0xdf   : > { %v2047_v15 = vpack.c.b16 %v543_v12, %v542_v8  ;;  %490 = vrot.lane.b32.xlu0 %v2045_v11, %s1831_s24  ;;  %v484_v16 = vpack.c.bf16 %v476_v14, %v476_v14 }
  0xe1   : > { %545 = vrot.lane.b32.xlu1 %v2047_v15, %s1831_s24  ;;  %v570_v18 = vunpack.c.l.b16 %v484_v16 }
  0xe3   : > { %v2051_v19 = vpack.c.b16 %v570_v18, %v569_v17 }
  0xe9   : > { %572 = vrot.lane.b32.xlu1 %v2051_v19, %s1831_s24  ;;  %s1762_s24 = sshra.s32 %s1229_s13, 4  ;;  %s1763_s24 = int_to_ptr.hbm [resolvable:$true] %s1762_s24 }
  0xea   : > { %p1769_p11 = scmp.lt.s32.totalorder %s1763_s24, %s2310_s5 }
 0x149   : > { %v519_v20 = vpop.permute.xlu0 %518 }
 0x14a   : > { %v524_v21 = vsel %vm492_vm3, %v519_v20, 0 }
 0x14b   : > { %533 = vmatpush.bf16.xpose.msrb.mxu2 %v524_v21 }
 0x151   : > { %v491_v22 = vpop.permute.xlu0 %490 }
 0x152   : > { %1390 = vmatmul.msk.bf16.vlgmr.msrb.gmra.mxu2 %vm492_vm3, %v2042_v1  ;;  %v497_v23 = vsel %vm492_vm3, %v491_v22, 0 }
 0x153   : > { %v546_v24 = vpop.permute.xlu1 %545  ;;  %506 = vmatpush.bf16.xpose.msrb.mxu1 %v497_v23 }
 0x154   : > { %v551_v25 = vsel %vm492_vm3, %v546_v24, 0 }
 0x155   : > { %560 = vmatpush.bf16.xpose.msrb.mxu3 %v551_v25 }
 0x15a   : > { %1389 = vmatmul.msk.bf16.vlgmr.msrb.gmra.mxu1 %vm492_vm3, %v2045_v11 }
 0x15b   : > { %v573_v26 = vpop.permute.xlu1 %572 }
 0x15c   : > { %1391 = vmatmul.msk.bf16.vlgmr.msrb.gmra.mxu3 %vm492_vm3, %v2047_v15  ;;  %v578_v27 = vsel %vm492_vm3, %v573_v26, 0 }
 0x15d   : > { %587 = vmatpush.bf16.xpose.msra.mxu1 %v578_v27 }
 0x16a   : > { %1392 = vmatmul.msk.bf16.vlgmr.msra.gmra.mxu1 %vm492_vm3, %v2051_v19 }
 0x1d5   : > { %v535_v28 = vpop.f32.mrf.mxu2 }
 0x1d6   : > { %v600_v29 = vsel %vm492_vm3, %v535_v28, -inf }
 0x1d7   : > { %601 = vmax.xlane.f32.xlu2 %v600_v29  ;;  %v508_v30 = vpop.f32.mrf.mxu1 }
 0x1d8   : > { %v594_v31 = vsel %vm492_vm3, %v508_v30, -inf }
 0x1d9   : > { %595 = vmax.xlane.f32.xlu0 %v594_v31 }
 0x1dd   : > { %v537_v36 = vpop.f32.mrf.mxu2 }
 0x1de   : > { %v603_v37 = vsel %vm492_vm3, %v537_v36, -inf }
 0x1df   : > { %v562_v32 = vpop.f32.mrf.mxu3  ;;  %v510_v33 = vpop.f32.mrf.mxu1 }
 0x1e0   : > { %v606_v34 = vsel %vm492_vm3, %v562_v32, -inf  ;;  %v597_v35 = vsel %vm492_vm3, %v510_v33, -inf }
 0x1e1   : > { %607 = vmax.xlane.f32.xlu2 %v606_v34  ;;  %598 = vmax.xlane.f32.xlu1 %v597_v35 }
 0x1e7   : > { %v589_v38 = vpop.f32.mrf.mxu1  ;;  %v2072_v40 = vpop.f32.mrf.mxu3 }
 0x1e8   : > { %v612_v39 = vsel %vm492_vm3, %v589_v38, -inf  ;;  %v609_v41 = vsel %vm492_vm3, %v2072_v40, -inf }
 0x1e9   : > { %604 = vmax.xlane.f32.xlu2 %v603_v37 }
 0x1ef   : > { %v591_v42 = vpop.f32.mrf.mxu1 }
 0x1f0   : > { %v615_v43 = vsel %vm492_vm3, %v591_v42, -inf }
 0x1f1   : > { %613 = vmax.xlane.f32.xlu2 %v612_v39 }
 0x1f9   : > { %610 = vmax.xlane.f32.xlu2 %v609_v41 }
 0x201   : > { %616 = vmax.xlane.f32.xlu2 %v615_v43 }
 0x24a   : > { %v602_v44 = vpop.xlane.xlu2 %601 }
 0x24b   : > { %v620_v45 = vsub.f32 %v535_v28, %v602_v44 }
 0x24c   : > { %v596_v46 = vpop.xlane.xlu0 %595 }
 0x24d   : > { %v630_v47 = vmul.f32 1.442695, %v620_v45  ;;  %v618_v48 = vsub.f32 %v508_v30, %v596_v46 }
 0x24f   : > { %1564 = vpow2.f32 %v630_v47  ;;  %v626_v49 = vmul.f32 1.442695, %v618_v48 }
 0x251   : > { %1566 = vpow2.f32 %v626_v49 }
 0x254   : > { %v608_v50 = vpop.xlane.xlu2 %607  ;;  %v599_v51 = vpop.xlane.xlu1 %598 }
 0x255   : > { %v2077_v52 = vpop.eup %1564  ;;  %v622_v53 = vsub.f32 %v562_v32, %v608_v50  ;;  %v619_v54 = vsub.f32 %v510_v33, %v599_v51 }
 0x256   : > { %v648_v55 = vsel %vm492_vm3, %v2077_v52, 0.0 }
 0x257   : > { %v2081_v56 = vpop.eup %1566  ;;  %v634_v57 = vmul.f32 1.442695, %v622_v53  ;;  %v628_v58 = vmul.f32 1.442695, %v619_v54  ;;  %649 = vadd.xlane.f32.xlu2 %v648_v55 }
 0x258   : > { %v642_v59 = vsel %vm492_vm3, %v2081_v56, 0.0 }
 0x259   : > { %1568 = vpow2.f32 %v634_v57  ;;  %643 = vadd.xlane.f32.xlu0 %v642_v59 }
 0x25a   : > { %1570 = vpow2.f32 %v628_v58 }
 0x25c   : > { %v605_v60 = vpop.xlane.xlu2 %604 }
 0x25d   : > { %v621_v61 = vsub.f32 %v537_v36, %v605_v60 }
 0x25f   : > { %v2085_v62 = vpop.eup %1568  ;;  %v632_v63 = vmul.f32 1.442695, %v621_v61 }
 0x260   : > { %v1571_v0 = vpop.eup %1570  ;;  %v654_v2 = vsel %vm492_vm3, %v2085_v62, 0.0 }
 0x261   : > { %1572 = vpow2.f32 %v632_v63  ;;  %655 = vadd.xlane.f32.xlu0 %v654_v2  ;;  %v645_v3 = vsel %vm492_vm3, %v1571_v0, 0.0 }
 0x262   : > { %646 = vadd.xlane.f32.xlu1 %v645_v3 }
 0x264   : > { %v614_v6 = vpop.xlane.xlu2 %613 }
 0x265   : > { %v624_v12 = vsub.f32 %v589_v38, %v614_v6 }
 0x267   : > { %v1573_v4 = vpop.eup %1572  ;;  %v638_v14 = vmul.f32 1.442695, %v624_v12 }
 0x268   : > { %v651_v5 = vsel %vm492_vm3, %v1573_v4, 0.0 }
 0x269   : > { %652 = vadd.xlane.f32.xlu2 %v651_v5 }
 0x26c   : > { %v611_v7 = vpop.xlane.xlu2 %610 }
 0x26d   : > { %v623_v20 = vsub.f32 %v2072_v40, %v611_v7 }
 0x26f   : > { %v636_v21 = vmul.f32 1.442695, %v623_v20 }
 0x274   : > { %v617_v8 = vpop.xlane.xlu2 %616 }
 0x275   : > { %695 = vrot.lane.b32.xlu0 %v2045_v11, %s1832_s29  ;;  %v625_v9 = vsub.f32 %v591_v42, %v617_v8 }
 0x277   : > { %v640_v10 = vmul.f32 1.442695, %v625_v9 }
 0x279   : > { %1574 = vpow2.f32 %v640_v10 }
 0x27a   : > { %1576 = vpow2.f32 %v638_v14 }
 0x27b   : > { %792 = vrot.lane.b32.xlu1 %v2045_v11, %s1833_s12  ;;  %1578 = vpow2.f32 %v636_v21 }
 0x27f   : > { %v2103_v13 = vpop.eup %1574 }
 0x280   : > { %v663_v16 = vsel %vm492_vm3, %v2103_v13, 0.0  ;;  %v2109_v17 = vpop.eup %1576 }
 0x281   : > { %720 = vrot.lane.b32.xlu2 %v2042_v1, %s1832_s29  ;;  %v660_v18 = vsel %vm492_vm3, %v2109_v17, 0.0  ;;  %v2116_v22 = vpop.eup %1578 }
 0x282   : > { %v657_v23 = vsel %vm492_vm3, %v2116_v22, 0.0 }
 0x283   : > { %790 = vrot.lane.b32.xlu1 %v2045_v11, %s1834_s23 }
 0x28b   : > { %745 = vrot.lane.b32.xlu1 %v2047_v15, %s1832_s29 }
 0x293   : > { %770 = vrot.lane.b32.xlu1 %v2051_v19, %s1832_s29 }
 0x29b   : > { %816 = vrot.lane.b32.xlu1 %v2042_v1, %s1833_s12 }
 0x29f   : > { %664 = vadd.xlane.f32.xlu0 %v663_v16 }
 0x2aa   : > { %661 = vadd.xlane.f32.xlu2 %v660_v18 }
 0x2b3   : > { %838 = vrot.lane.b32.xlu0 %v2047_v15, %s1834_s23 }
 0x2c2   : > { %840 = vrot.lane.b32.xlu2 %v2047_v15, %s1833_s12 }
 0x2c5   : > { %658 = vadd.xlane.f32.xlu1 %v657_v23 }
 0x2ca   : > { %v650_v25 = vpop.xlane.xlu2 %649 }
 0x2cc   : > { %v644_v24 = vpop.xlane.xlu0 %643 }
 0x2cd   : > { %1580 = vrcp.f32 %v644_v24 }
 0x2d3   : > { %v1581_v27 = vpop.eup %1580 }
 0x2d4   : > { %v674_v32 = vmul.f32 %v1581_v27, %v2081_v56  ;;  %v656_v33 = vpop.xlane.xlu0 %655 }
 0x2d5   : > { %v647_v26 = vpop.xlane.xlu1 %646 }
 0x2d6   : > { %1582 = vrcp.f32 %v647_v26  ;;  %v682_v37 = vpack.c.bf16 %v674_v32, %v674_v32 }
 0x2d7   : > { %1584 = vrcp.f32 %v650_v25 }
 0x2d8   : > { %v692_v43 = vunpack.c.l.b16 %v682_v37 }
 0x2dc   : > { %v1583_v28 = vpop.eup %1582  ;;  %v653_v29 = vpop.xlane.xlu2 %652 }
 0x2dd   : > { %v1585_v30 = vpop.eup %1584  ;;  %v675_v31 = vmul.f32 %v1583_v28, %v1571_v0  ;;  %1586 = vrcp.f32 %v653_v29 }
 0x2de   : > { %814 = vrot.lane.b32.xlu1 %v2042_v1, %s1834_s23  ;;  %v676_v34 = vmul.f32 %v1585_v30, %v2077_v52 }
 0x2df   : > { %v683_v35 = vpack.c.bf16 %v675_v31, %v675_v31 }
 0x2e0   : > { %v684_v38 = vpack.c.bf16 %v676_v34, %v676_v34 }
 0x2e1   : > { %v693_v41 = vunpack.c.l.b16 %v683_v35 }
 0x2e2   : > { %v717_v45 = vunpack.c.l.b16 %v684_v38 }
 0x2e3   : > { %v1587_v36 = vpop.eup %1586  ;;  %v694_v47 = vpack.c.b16 %v693_v41, %v692_v43 }
 0x2e4   : > { %v677_v39 = vmul.f32 %v1587_v36, %v1573_v4  ;;  %v721_v40 = vpop.permute.xlu2 %720 }
 0x2e5   : > { %733 = vmatpush.bf16.msra.mxu3 %v721_v40 }
 0x2e6   : > { %v685_v42 = vpack.c.bf16 %v677_v39, %v677_v39  ;;  %864 = vrot.lane.b32.xlu1 %v2051_v19, %s1833_s12  ;;  %s1764_s12 = scalar_lea.hbm %s1763_s24, 64 }
 0x2e7   : > { %v696_v44 = vpop.permute.xlu0 %695  ;;  %p1765_p1 = scmp.ne.s32.totalorder %s1763_s24, %s1764_s12 }
 0x2e8   : > { %v718_v46 = vunpack.c.l.b16 %v685_v42  ;;  %708 = vmatpush.bf16.msra.mxu2 %v696_v44 }
 0x2e9   : > { %p1766_p4 = pnand %p1765_p1, %p1956_p3 }
 0x2ea   : > { %v719_v48 = vpack.c.b16 %v718_v46, %v717_v45 }
 0x2eb   : > { %1393 = vmatmul.msk.bf16.vlgmr.msra.gmra.mxu2 %vm492_vm3, %v694_v47  ;;  %p1767_p8 = pneg %p1766_p4 }
 0x2ec   : > { %1394 = vmatmul.msk.bf16.vlgmr.msra.gmra.mxu3 %vm492_vm3, %v719_v48 }
 0x2ed   : > { %v793_v49 = vpop.permute.xlu1 %792 }
 0x2ee   : > { %v798_v50 = vsel %vm492_vm3, %v793_v49, 0  ;;  %862 = vrot.lane.b32.xlu1 %v2051_v19, %s1834_s23 }
 0x2ef   : > { %807 = vmatpush.bf16.xpose.msrb.mxu3 %v798_v50 }
 0x2f5   : > { %v791_v51 = vpop.permute.xlu1 %790 }
 0x2fc   : > { %1397 = vmatmul.msk.bf16.vlgmr.msrb.gmra.mxu3 %vm492_vm3, %v791_v51 }
 0x2fd   : > { %v746_v52 = vpop.permute.xlu1 %745 }
 0x2fe   : > { %758 = vmatpush.bf16.msrb.mxu1 %v746_v52 }
 0x305   : > { %v771_v53 = vpop.permute.xlu1 %770 }
 0x306   : > { %783 = vmatpush.bf16.msrb.mxu2 %v771_v53 }
 0x30d   : > { %v817_v54 = vpop.permute.xlu1 %816 }
 0x30e   : > { %v822_v55 = vsel %vm492_vm3, %v817_v54, 0 }
 0x30f   : > { %831 = vmatpush.bf16.xpose.msra.mxu1 %v822_v55 }
 0x312   : > { %v665_v56 = vpop.xlane.xlu0 %664 }
 0x313   : > { %1588 = vrcp.f32 %v665_v56 }
 0x319   : > { %v1589_v58 = vpop.eup %1588 }
 0x31a   : > { %v681_v59 = vmul.f32 %v1589_v58, %v2103_v13 }
 0x31c   : > { %v689_v61 = vpack.c.bf16 %v681_v59, %v681_v59 }
 0x31d   : > { %v662_v57 = vpop.xlane.xlu2 %661 }
 0x31e   : > { %1590 = vrcp.f32 %v662_v57  ;;  %v768_v4 = vunpack.c.l.b16 %v689_v61 }
 0x31f   : > { %1592 = vrcp.f32 %v656_v33 }
 0x324   : > { %v1591_v60 = vpop.eup %1590 }
 0x325   : > { %v680_v63 = vmul.f32 %v1591_v60, %v2109_v17  ;;  %v841_v0 = vpop.permute.xlu2 %840  ;;  %v1593_v8 = vpop.eup %1592 }
 0x326   : > { %v846_v2 = vsel %vm492_vm3, %v841_v0, 0  ;;  %v678_v9 = vmul.f32 %v1593_v8, %v2085_v62  ;;  %v839_v10 = vpop.permute.xlu0 %838 }
 0x327   : > { %v688_v3 = vpack.c.bf16 %v680_v63, %v680_v63  ;;  %855 = vmatpush.bf16.xpose.msra.mxu2 %v846_v2 }
 0x328   : > { %v686_v13 = vpack.c.bf16 %v678_v9, %v678_v9 }
 0x329   : > { %v767_v5 = vunpack.c.l.b16 %v688_v3 }
 0x32a   : > { %v742_v17 = vunpack.c.l.b16 %v686_v13 }
 0x32b   : > { %v769_v6 = vpack.c.b16 %v768_v4, %v767_v5 }
 0x32d   : > { %1396 = vmatmul.msk.bf16.vlgmr.msrb.gmra.mxu2 %vm492_vm3, %v769_v6 }
 0x338   : > { %v659_v7 = vpop.xlane.xlu1 %658 }
 0x339   : > { %1594 = vrcp.f32 %v659_v7 }
 0x33d   : > { %1399 = vmatmul.msk.bf16.vlgmr.msra.gmra.mxu2 %vm492_vm3, %v839_v10 }
 0x33f   : > { %v1595_v12 = vpop.eup %1594 }
 0x340   : > { %v679_v14 = vmul.f32 %v1595_v12, %v2116_v22 }
 0x342   : > { %v687_v16 = vpack.c.bf16 %v679_v14, %v679_v14 }
 0x344   : > { %v743_v18 = vunpack.c.l.b16 %v687_v16 }
 0x346   : > { %v744_v20 = vpack.c.b16 %v743_v18, %v742_v17 }
 0x348   : > { %1395 = vmatmul.msk.bf16.vlgmr.msrb.gmra.mxu1 %vm492_vm3, %v744_v20 }
 0x350   : > { %v815_v21 = vpop.permute.xlu1 %814 }
 0x358   : > { %1398 = vmatmul.msk.bf16.vlgmr.msra.gmra.mxu1 %vm492_vm3, %v815_v21  ;;  %v865_v23 = vpop.permute.xlu1 %864 }
 0x359   : > { %v870_v24 = vsel %vm492_vm3, %v865_v23, 0 }
 0x35a   : > { %879 = vmatpush.bf16.xpose.msra.mxu3 %v870_v24 }
 0x360   : > { %v863_v62 = vpop.permute.xlu1 %862 }
 0x361   : > { %1400 = vmatmul.msk.bf16.vlgmr.msra.gmra.mxu3 %vm492_vm3, %v863_v62 }
 0x36e   : > { %v2152_v30 = vpop.f32.mrf.mxu2 }
 0x36f   : > { %v2146_v25 = vpop.f32.mrf.mxu3 }
 0x376   : > { %v2154_v31 = vpop.f32.mrf.mxu2 }
 0x377   : > { %v2148_v26 = vpop.f32.mrf.mxu3 }
 0x37f   : > { %v809_v22 = vpop.f32.mrf.mxu3 }
 0x380   : > { %v886_v27 = vsel %vm492_vm3, %v809_v22, -inf }
 0x381   : > { %887 = vmax.xlane.f32.xlu2 %v886_v27 }
 0x387   : > { %v811_v28 = vpop.f32.mrf.mxu3 }
 0x388   : > { %v889_v29 = vsel %vm492_vm3, %v811_v28, -inf }
 0x389   : > { %890 = vmax.xlane.f32.xlu1 %v889_v29 }
 0x3b0   : > { %v2156_v32 = vpop.f32.mrf.mxu2 }
 0x3b8   : > { %v2158_v33 = vpop.f32.mrf.mxu2 }
 0x3c0   : > { %v857_v34 = vpop.f32.mrf.mxu2 }
 0x3c1   : > { %v898_v35 = vsel %vm492_vm3, %v857_v34, -inf }
 0x3c2   : > { %899 = vmax.xlane.f32.xlu1 %v898_v35 }
 0x3c5   : > { %v2161_v36 = vpop.f32.mrf.mxu1 }
 0x3c8   : > { %v2166_v40 = vpop.f32.mrf.mxu2 }
 0x3c9   : > { %v901_v43 = vsel %vm492_vm3, %v2166_v40, -inf }
 0x3cd   : > { %v2163_v37 = vpop.f32.mrf.mxu1 }
 0x3d5   : > { %v833_v38 = vpop.f32.mrf.mxu1 }
 0x3d6   : > { %v892_v39 = vsel %vm492_vm3, %v833_v38, -inf }
 0x3d7   : > { %893 = vmax.xlane.f32.xlu0 %v892_v39 }
 0x3dd   : > { %v835_v41 = vpop.f32.mrf.mxu1 }
 0x3de   : > { %v895_v42 = vsel %vm492_vm3, %v835_v41, -inf }
 0x3df   : > { %896 = vmax.xlane.f32.xlu2 %v895_v42  ;;  %902 = vmax.xlane.f32.xlu0 %v901_v43 }
 0x3e4   : > { %v881_v44 = vpop.f32.mrf.mxu3 }
 0x3e5   : > { %v904_v45 = vsel %vm492_vm3, %v881_v44, -inf }
 0x3e7   : > { %905 = vmax.xlane.f32.xlu2 %v904_v45 }
 0x3ec   : > { %v2172_v46 = vpop.f32.mrf.mxu3 }
 0x3ed   : > { %v907_v47 = vsel %vm492_vm3, %v2172_v46, -inf }
 0x3ee   : > { %908 = vmax.xlane.f32.xlu1 %v907_v47 }
 0x3f4   : > { %v888_v48 = vpop.xlane.xlu2 %887 }
 0x3f5   : > { %v910_v49 = vsub.f32 %v809_v22, %v888_v48 }
 0x3f7   : > { %v918_v50 = vmul.f32 1.442695, %v910_v49 }
 0x3f9   : > { %1596 = vpow2.f32 %v918_v50 }
 0x3fc   : > { %v891_v51 = vpop.xlane.xlu1 %890 }
 0x3fd   : > { %v911_v52 = vsub.f32 %v811_v28, %v891_v51 }
 0x3ff   : > { %v1597_v53 = vpop.eup %1596  ;;  %v920_v54 = vmul.f32 1.442695, %v911_v52 }
 0x400   : > { %v934_v55 = vsel %vm492_vm3, %v1597_v53, 0.0 }
 0x401   : > { %1598 = vpow2.f32 %v920_v54  ;;  %935 = vadd.xlane.f32.xlu0 %v934_v55 }
 0x407   : > { %v1599_v56 = vpop.eup %1598  ;;  %987 = vrot.lane.b32.xlu1 %v2045_v11, %s1835_s27 }
 0x408   : > { %v937_v57 = vsel %vm492_vm3, %v1599_v56, 0.0 }
 0x409   : > { %938 = vadd.xlane.f32.xlu2 %v937_v57 }
 0x435   : > { %v900_v58 = vpop.xlane.xlu1 %899 }
 0x436   : > { %v914_v61 = vsub.f32 %v857_v34, %v900_v58 }
 0x438   : > { %v926_v0 = vmul.f32 1.442695, %v914_v61 }
 0x44a   : > { %v894_v59 = vpop.xlane.xlu0 %893 }
 0x44b   : > { %v912_v60 = vsub.f32 %v833_v38, %v894_v59 }
 0x44d   : > { %v922_v63 = vmul.f32 1.442695, %v912_v60 }
 0x44f   : > { %1600 = vpow2.f32 %v922_v63 }
 0x450   : > { %1602 = vpow2.f32 %v926_v0 }
 0x452   : > { %v897_v2 = vpop.xlane.xlu2 %896  ;;  %v903_v17 = vpop.xlane.xlu0 %902 }
 0x453   : > { %v913_v3 = vsub.f32 %v835_v41, %v897_v2  ;;  %v915_v39 = vsub.f32 %v2166_v40, %v903_v17 }
 0x455   : > { %v1601_v4 = vpop.eup %1600  ;;  %v924_v5 = vmul.f32 1.442695, %v913_v3  ;;  %v928_v41 = vmul.f32 1.442695, %v915_v39 }
 0x456   : > { %v940_v6 = vsel %vm492_vm3, %v1601_v4, 0.0  ;;  %v2181_v7 = vpop.eup %1602 }
 0x457   : > { %941 = vadd.xlane.f32.xlu0 %v940_v6  ;;  %1604 = vpow2.f32 %v924_v5  ;;  %v946_v12 = vsel %vm492_vm3, %v2181_v7, 0.0 }
 0x45a   : > { %v906_v11 = vpop.xlane.xlu2 %905 }
 0x45b   : > { %v916_v8 = vsub.f32 %v881_v44, %v906_v11 }
 0x45d   : > { %v930_v9 = vmul.f32 1.442695, %v916_v8  ;;  %v1605_v10 = vpop.eup %1604 }
 0x45e   : > { %v943_v13 = vsel %vm492_vm3, %v1605_v10, 0.0 }
 0x45f   : > { %1606 = vpow2.f32 %v930_v9  ;;  %947 = vadd.xlane.f32.xlu0 %v946_v12  ;;  %944 = vadd.xlane.f32.xlu2 %v943_v13 }
 0x461   : > { %v909_v18 = vpop.xlane.xlu1 %908 }
 0x465   : > { %v2186_v14 = vpop.eup %1606 }
 0x466   : > { %v952_v16 = vsel %vm492_vm3, %v2186_v14, 0.0 }
 0x467   : > { %953 = vadd.xlane.f32.xlu1 %v952_v16 }
 0x473   : > { %1012 = vrot.lane.b32.xlu0 %v2042_v1, %s1835_s27  ;;  %v917_v1 = vsub.f32 %v2172_v46, %v909_v18 }
 0x474   : > { %v936_v20 = vpop.xlane.xlu0 %935 }
 0x475   : > { %1608 = vrcp.f32 %v936_v20 }
 0x477   : > { %1037 = vrot.lane.b32.xlu2 %v2047_v15, %s1835_s27  ;;  %v932_v15 = vmul.f32 1.442695, %v917_v1 }
 0x479   : > { %v988_v21 = vpop.permute.xlu1 %987 }
 0x47a   : > { %1000 = vmatpush.bf16.msrb.mxu0 %v988_v21 }
 0x47b   : > { %v1609_v24 = vpop.eup %1608 }
 0x47c   : > { %v939_v23 = vpop.xlane.xlu2 %938  ;;  %v966_v62 = vmul.f32 %v1609_v24, %v1597_v53 }
 0x47d   : > { %1610 = vrcp.f32 %v939_v23 }
 0x47e   : > { %v974_v27 = vpack.c.bf16 %v966_v62, %v966_v62  ;;  %1612 = vpow2.f32 %v932_v15  ;;  %v1445_v62 = vld [vmem:[#allocation9] sm:$0xff] }
 0x47f   : > { %1614 = vpow2.f32 %v928_v41 }
 0x480   : > { %v984_v34 = vunpack.c.l.b16 %v974_v27 }
 0x483   : > { %v1611_v22 = vpop.eup %1610 }
 0x484   : > { %v967_v28 = vmul.f32 %v1611_v22, %v1599_v56  ;;  %v1613_v42 = vpop.eup %1612 }
 0x485   : > { %v955_v43 = vsel %vm492_vm3, %v1613_v42, 0.0  ;;  %v1615_v44 = vpop.eup %1614 }
 0x486   : > { %v975_v29 = vpack.c.bf16 %v967_v28, %v967_v28  ;;  %v949_v45 = vsel %vm492_vm3, %v1615_v44, 0.0 }
 0x488   : > { %v985_v35 = vunpack.c.l.b16 %v975_v29 }
 0x48a   : > { %v986_v38 = vpack.c.b16 %v985_v35, %v984_v34 }
 0x48c   : > { %1401 = vmatmul.msk.bf16.vlgmr.msrb.gmra.mxu0 %vm492_vm3, %v986_v38 }
 0x49d   : > { %956 = vadd.xlane.f32.xlu0 %v955_v43 }
 0x4a0   : > { %950 = vadd.xlane.f32.xlu2 %v949_v45 }
 0x4b8   : > { %1062 = vrot.lane.b32.xlu2 %v2051_v19, %s1835_s27 }
 0x4ca   : > { %v942_v46 = vpop.xlane.xlu0 %941 }
 0x4cb   : > { %1616 = vrcp.f32 %v942_v46 }
 0x4d1   : > { %v1617_v40 = vpop.eup %1616 }
 0x4d2   : > { %v945_v47 = vpop.xlane.xlu2 %944  ;;  %v968_v51 = vmul.f32 %v1617_v40, %v1601_v4  ;;  %v948_v52 = vpop.xlane.xlu0 %947 }
 0x4d3   : > { %1618 = vrcp.f32 %v945_v47 }
 0x4d4   : > { %v976_v54 = vpack.c.bf16 %v968_v51, %v968_v51 }
 0x4d6   : > { %v1009_v56 = vunpack.c.l.b16 %v976_v54 }
 0x4d9   : > { %v1619_v48 = vpop.eup %1618 }
 0x4da   : > { %v969_v49 = vmul.f32 %v1619_v48, %v1605_v10  ;;  %v1038_v50 = vpop.permute.xlu2 %1037  ;;  %v954_v19 = vpop.xlane.xlu1 %953 }
 0x4db   : > { %1050 = vmatpush.bf16.msrb.mxu2 %v1038_v50  ;;  %1620 = vrcp.f32 %v954_v19 }
 0x4dc   : > { %v977_v53 = vpack.c.bf16 %v969_v49, %v969_v49  ;;  %1622 = vrcp.f32 %v948_v52  ;;  %v1563_v49 = vld [vmem:[%s2309_s4] ss:$0 sm:$0xff] }
 0x4de   : > { %v1010_v55 = vunpack.c.l.b16 %v977_v53 }
 0x4e0   : > { %v1011_v58 = vpack.c.b16 %v1010_v55, %v1009_v56 }
 0x4e1   : > { %v1621_v61 = vpop.eup %1620 }
 0x4e2   : > { %v972_v2 = vmul.f32 %v1621_v61, %v2186_v14  ;;  %v1623_v4 = vpop.eup %1622 }
 0x4e3   : > { %v970_v6 = vmul.f32 %v1623_v4, %v2181_v7  ;;  %v1446_v7 = vld [vmem:[#allocation9 + $0x8] sm:$0xff] }
 0x4e4   : > { %v980_v11 = vpack.c.bf16 %v972_v2, %v972_v2  ;;  %1164 = vmatpush.bf16.msra.mxu0 %v1446_v7 }
 0x4e5   : > { %v1013_v57 = vpop.permute.xlu0 %1012  ;;  %v978_v12 = vpack.c.bf16 %v970_v6, %v970_v6 }
 0x4e6   : > { %1025 = vmatpush.bf16.msrb.mxu1 %v1013_v57  ;;  %v1059_v13 = vunpack.c.l.b16 %v980_v11 }
 0x4e7   : > { %v1034_v21 = vunpack.c.l.b16 %v978_v12 }
 0x4e8   : > { %1165 = vmatpush.bf16.msra.mxu0 %v1445_v62 }
 0x4e9   : > { %1402 = vmatmul.msk.bf16.vlgmr.msrb.gmra.mxu1 %vm492_vm3, %v1011_v58 }
 0x509   : > { %v1002_v59 = vpop.f32.mrf.mxu0 }
 0x510   : > { %v957_v60 = vpop.xlane.xlu0 %956 }
 0x511   : > { %1624 = vrcp.f32 %v957_v60  ;;  %v1004_v63 = vpop.f32.mrf.mxu0 }
 0x512   : > { %v1543_v0 = vpack.i.bf16 %v1004_v63, %v1002_v59 }
 0x513   : > { %v951_v3 = vpop.xlane.xlu2 %950 }
 0x514   : > { %1544 = vrot.lane.b32.xlu2 %v1543_v0, %s1836_s28  ;;  %1626 = vrcp.f32 %v951_v3 }
 0x517   : > { %v1625_v5 = vpop.eup %1624 }
 0x518   : > { %v973_v8 = vmul.f32 %v1625_v5, %v1613_v42 }
 0x51a   : > { %v981_v9 = vpack.c.bf16 %v973_v8, %v973_v8  ;;  %v1627_v10 = vpop.eup %1626 }
 0x51b   : > { %v971_v17 = vmul.f32 %v1627_v10, %v1615_v44  ;;  %v1063_v18 = vpop.permute.xlu2 %1062 }
 0x51c   : > { %v1060_v16 = vunpack.c.l.b16 %v981_v9  ;;  %1075 = vmatpush.bf16.msrb.mxu3 %v1063_v18 }
 0x51d   : > { %v979_v20 = vpack.c.bf16 %v971_v17, %v971_v17 }
 0x51e   : > { %v1061_v14 = vpack.c.b16 %v1060_v16, %v1059_v13 }
 0x51f   : > { %v1035_v23 = vunpack.c.l.b16 %v979_v20 }
 0x520   : > { %1404 = vmatmul.msk.bf16.vlgmr.msrb.gmra.mxu3 %vm492_vm3, %v1061_v14 }
 0x521   : > { %v1036_v24 = vpack.c.b16 %v1035_v23, %v1034_v21 }
 0x523   : > { %1403 = vmatmul.msk.bf16.vlgmr.msrb.gmra.mxu2 %vm492_vm3, %v1036_v24 }
 0x566   : > { %v1027_v22 = vpop.f32.mrf.mxu1 }
 0x56e   : > { %v1545_v27 = vpop.permute.xlu2 %1544  ;;  %v1029_v28 = vpop.f32.mrf.mxu1 }
 0x56f   : > { %v1547_v29 = vunpack.i.h.bf16 %v1545_v27  ;;  %v1546_v34 = vunpack.i.l.bf16 %v1545_v27  ;;  %v1548_v35 = vpack.i.bf16 %v1029_v28, %v1027_v22 }
 0x571   : > { %v1115_v38 = vsel %vm492_vm3, %v2154_v31, %v1547_v29  ;;  %v1114_v1 = vsel %vm492_vm3, %v2152_v30, %v1546_v34  ;;  %1549 = vrot.lane.b32.xlu2 %v1548_v35, %s1836_s28 }
 0x572   : > { %v1122_v39 = vpack.c.bf16 %v1115_v38, %v1114_v1 }
 0x574   : > { %1413 = vmatmul.msk.bf16.vlgmr.msra.gmra.mxu0 %vm425_vm2, %v1122_v39 }
 0x5a3   : > { %v1077_v15 = vpop.f32.mrf.mxu3 }
 0x5a6   : > { %v1052_v41 = vpop.f32.mrf.mxu2 }
 0x5ab   : > { %v1079_v42 = vpop.f32.mrf.mxu3 }
 0x5ac   : > { %v1558_v43 = vpack.i.bf16 %v1079_v42, %v1077_v15 }
 0x5ae   : > { %1559 = vrot.lane.b32.xlu2 %v1558_v43, %s1836_s28  ;;  %v1054_v44 = vpop.f32.mrf.mxu2 }
 0x5af   : > { %v1553_v45 = vpack.i.bf16 %v1054_v44, %v1052_v41 }
 0x5b1   : > { %1554 = vrot.lane.b32.xlu1 %v1553_v45, %s1836_s28  ;;  %s1768_s28 = scalar_lea.hbm %s2310_s5, 128 }
 0x5b2   : > { %p1770_p9 = scmp.lt.s32.totalorder %s1768_s28, %s1764_s12 }
 0x5b4   : > { %p1771_p2 = por %p1770_p9, %p1769_p11 }
 0x5b6   : > { %p1772_p10 = pnand %p1771_p2, %p1767_p8 }
 0x5cb   : > { %v1550_v31 = vpop.permute.xlu2 %1549 }
 0x5cc   : > { %v1552_v46 = vunpack.i.h.bf16 %v1550_v31  ;;  %v1551_v47 = vunpack.i.l.bf16 %v1550_v31 }
 0x5ce   : > { %v1116_v30 = vsel %vm492_vm3, %v2146_v25, %v1551_v47  ;;  %v1117_v40 = vsel %vm492_vm3, %v2148_v26, %v1552_v46 }
 0x5cf   : > { %v1123_v48 = vpack.c.bf16 %v1117_v40, %v1116_v30 }
 0x5d1   : > { %1414 = vmatmul.msk.bf16.gmra.mxu0 %vm425_vm2, %v1123_v48 }
 0x5f1   : > { %v1167_v50 = vpop.f32.mrf.mxu0 }
 0x5f2   : > { %v1168_v51 = vadd.f32 %v1563_v49, %v1167_v50 }
 0x5f4   : > { %1188 = vst.msk [vmem:[%s2225_s14] sm:$0xf] %vm1187_vm4, %v1168_v51 }
 0x5f5   : > { %1417 = vst.msk [vmem:[%s2225_s14 + $0x4] sm:$0xf0] %vm1191_vm5, %v1168_v51 }
 0x5f9   : > { %v1169_v25 = vpop.f32.mrf.mxu0 }
 0x5fa   : > { %v1170_v26 = vadd.f32 %v1563_v49, %v1169_v25 }
 0x5fc   : > { %1419 = vst.msk [vmem:[%s2225_s14 + $0x10] sm:$0xf] %vm1187_vm4, %v1170_v26 }
 0x5fd   : > { %1421 = vst.msk [vmem:[%s2225_s14 + $0x14] sm:$0xf0] %vm1191_vm5, %v1170_v26 }
 0x608   : > { %v1560_v58 = vpop.permute.xlu2 %1559 }
 0x609   : > { %v1562_v19 = vunpack.i.h.bf16 %v1560_v58  ;;  %v1561_v59 = vunpack.i.l.bf16 %v1560_v58 }
 0x60b   : > { %v1120_v60 = vsel %vm492_vm3, %v2156_v32, %v1561_v59  ;;  %v1121_v61 = vsel %vm492_vm3, %v2158_v33, %v1562_v19 }
 0x623   : > { %v1555_v52 = vpop.permute.xlu1 %1554 }
 0x624   : > { %v1557_v53 = vunpack.i.h.bf16 %v1555_v52  ;;  %v1556_v54 = vunpack.i.l.bf16 %v1555_v52 }
 0x626   : > { %v1118_v55 = vsel %vm492_vm3, %v2161_v36, %v1556_v54  ;;  %v1119_v56 = vsel %vm492_vm3, %v2163_v37, %v1557_v53  ;;  %v1125_v36 = vpack.c.bf16 %v1121_v61, %v1120_v60 }
 0x627   : > { %v1124_v57 = vpack.c.bf16 %v1119_v56, %v1118_v55 }
 0x629   : > { %1415 = vmatmul.msk.bf16.gmra.mxu0 %vm425_vm2, %v1124_v57 }
 0x639   : > { %1416 = vmatmul.msk.bf16.gmra.mxu0 %vm425_vm2, %v1125_v36 }
 0x64e   : > { %v1172_v37 = vpop.f32.mrf.mxu0 }
 0x64f   : > { %v1173_v63 = vadd.f32 %v1563_v49, %v1172_v37 }
 0x651   : > { %1189 = vst.msk [vmem:[%s2225_s14 + $0x4] sm:$0xf] %vm1187_vm4, %v1173_v63 }
 0x652   : > { %1418 = vst.msk [vmem:[%s2225_s14 + $0x8] sm:$0xf0] %vm1191_vm5, %v1173_v63 }
 0x656   : > { %v1174_v0 = vpop.f32.mrf.mxu0 }
 0x657   : > { %v1175_v2 = vadd.f32 %v1563_v49, %v1174_v0 }
 0x659   : > { %1420 = vst.msk [vmem:[%s2225_s14 + $0x14] sm:$0xf] %vm1187_vm4, %v1175_v2 }
 0x65a   : > { %1422 = vst.msk [vmem:[%s2225_s14 + $0x18] sm:$0xf0] %vm1191_vm5, %v1175_v2 }
 0x6a6   : > { %v1177_v32 = vpop.f32.mrf.mxu0 }
 0x6a7   : > { %v1178_v33 = vadd.f32 %v1563_v49, %v1177_v32 }
 0x6a9   : > { %1423 = vst.msk [vmem:[%s2225_s14 + $0x20] sm:$0xf] %vm1187_vm4, %v1178_v33 }
 0x6aa   : > { %1425 = vst.msk [vmem:[%s2225_s14 + $0x24] sm:$0xf0] %vm1191_vm5, %v1178_v33 }
 0x6ae   : > { %v1179_v3 = vpop.f32.mrf.mxu0 }
 0x6af   : > { %v1180_v4 = vadd.f32 %v1563_v49, %v1179_v3 }
 0x6b1   : > { %1427 = vst.msk [vmem:[%s2225_s14 + $0x30] sm:$0xf] %vm1187_vm4, %v1180_v4 }
 0x6b2   : > { %1429 = vst.msk [vmem:[%s2225_s14 + $0x34] sm:$0xf0] %vm1191_vm5, %v1180_v4 }
 0x6b6   : > { %v1182_v5 = vpop.f32.mrf.mxu0 }
 0x6b7   : > { %v1183_v6 = vadd.f32 %v1563_v49, %v1182_v5 }
 0x6b9   : > { %1424 = vst.msk [vmem:[%s2225_s14 + $0x24] sm:$0xf] %vm1187_vm4, %v1183_v6 }
 0x6ba   : > { %1426 = vst.msk [vmem:[%s2225_s14 + $0x28] sm:$0xf0] %vm1191_vm5, %v1183_v6 }
 0x6be   : > { %v1184_v11 = vpop.f32.mrf.mxu0 }
 0x6bf   : > { %v1185_v8 = vadd.f32 %v1563_v49, %v1184_v11 }
 0x6c1   : > { %1428 = vst.msk [vmem:[%s2225_s14 + $0x34] sm:$0xf] %vm1187_vm4, %v1185_v8 }
 0x6c2   : > { %1430 = vst.msk [vmem:[%s2225_s14 + $0x38] sm:$0xf0] %vm1191_vm5, %v1185_v8 }
 0x6c3   : > { %1775 = shalt.err (!%p1772_p10)
}
 0x6c4   : > { %s1837_s26 = smov 4  }
 0x6c5   : > { %1469 = dma.vmem_to_hbm [thread:$0]  (%p1956_p3), %s1227_s8, 1024, %s1229_s13, %s1213_s22, %s1832_s29, %s1832_s29, %s1837_s26  }
 0x6c6 PF: > { %s1243_s14 = sand.u32 1, %s1810_s18   ;;  %p2319_p12 = scmp.ge.s32.totalorder %s1822_s21, 2 }
 0x6c7   : > { %s1244_s16 = scalar_lea.sflag [#allocation5], %s1243_s14 }
 0x6c8   : > { %p1486_p13 = pnand %p2319_p12, %p1903_p6 }
 0x6ca   : > { %p1487_p0 = pneg %p1486_p13 }
 0x6cc   : > { %1805 = dma.done.wait (%p1487_p0), %s1244_s16, 1024  }
 0x6cd   : > { %1807 = vsyncadd (%p1487_p0), %s1244_s16, 4294966272  ;;  %p20_p5 = scmp.ge.s32.totalorder %s1943_s30, 4   ;;  %s2320_s18 = smov %s1814_s19 }
 0x6ce   : > { %s2321_s19 = smov %s1818_s20  ;;  %s2322_s20 = smov %s1952_s9 }
 0x6cf   : > { %s2323_s21 = smov %s1943_s30  ;;  %22 = sbr.rel (!%p20_p5) target bundleno = 7 (0x7), region = 112 }
 0x6d4   :  { %1250 = vsyncpa [#allocation4], 1 }
 0x6d5   :  { %1252 = vsyncpa [#allocation4 + $0x1], 1 }
 0x6d6   :  { %1253 = vsyncpa [#allocation7], 1 }
 0x6d7   :  { %1254 = vsyncpa [#allocation10], 1 }
 0x6d8   :  { %1255 = vsyncpa [#allocation5], 1 }
 0x6d9   :  { %1257 = vsyncpa [#allocation5 + $0x1], 1 }

</bundles_post_ra>
